<compile_context>
chip_gen: v7x
topology: tpu7x:2x2x1
jax: 0.10.0
libtpu: 0.0.40
codegen_flags: <defaults>
</compile_context>

<pallas_src>
import jax
import jax.numpy as jnp
from jax.experimental import pallas as pl
from jax.experimental.pallas import tpu as pltpu


def _sae_kernel(x_ref, w_enc_ref, ev_ref, w_dec_ref, b_dec_ref, o_ref):
    j = pl.program_id(1)

    # Initialize the resident output block with b_dec on the first j step.
    @pl.when(j == 0)
    def _():
        o_ref[...] = jnp.broadcast_to(b_dec_ref[...], o_ref.shape).astype(
            o_ref.dtype)

    # Encode: pre-activations for this d_sae tile (bf16 operands, f32 acc).
    pre = jnp.dot(x_ref[...], w_enc_ref[...],
                  preferred_element_type=jnp.float32)
    pre = pre + ev_ref[0:1, :]                       # + b_enc   (f32)

    # JumpReLU: (pre > threshold) * relu(pre)   — all f32 elementwise.
    acts = jnp.where(pre > ev_ref[1:2, :], jnp.maximum(pre, 0.0), 0.0)

    # Decode: partial sum over d_sae tiles, accumulated in the f32 output block.
    o_ref[...] += jnp.dot(acts.astype(w_dec_ref.dtype), w_dec_ref[...],
                          preferred_element_type=jnp.float32)


def _pick_tile(total, want, align):
    """Largest tile <= want that divides `total` and is a multiple of `align`
    (or equals `total`)."""
    want = max(1, min(want, total))
    for t in range(want, 0, -1):
        if total % t == 0 and (t % align == 0 or t == total):
            return t
    return total


def jumprelu_sae_forward(x, w_enc, b_enc, threshold, w_dec, b_dec,
                         *, tm=256, tsae=512, compute_dtype=jnp.bfloat16):
    """Fused JumpReLU SAE forward.  Returns f32 reconstruction [N, d_model]."""
    N, d_model = x.shape
    d_sae = w_enc.shape[1]
    assert w_enc.shape == (d_model, d_sae)
    assert w_dec.shape == (d_sae, d_model)
    assert b_enc.shape == (d_sae,) and threshold.shape == (d_sae,)
    assert b_dec.shape == (d_model,)

    tm = _pick_tile(N, tm, 8)
    tsae = _pick_tile(d_sae, tsae, 128)

    # MXU operands in bf16; per-feature vectors stay f32 (elementwise path).
    xq = x.astype(compute_dtype)
    w_enc_q = w_enc.astype(compute_dtype)
    w_dec_q = w_dec.astype(compute_dtype)
    enc_vecs = jnp.stack([b_enc, threshold]).astype(jnp.float32)   # (2, d_sae)
    b_dec2 = b_dec.reshape(1, d_model).astype(jnp.float32)

    grid = (N // tm, d_sae // tsae)

    return pl.pallas_call(
        _sae_kernel,
        out_shape=jax.ShapeDtypeStruct((N, d_model), jnp.float32),
        grid_spec=pltpu.PrefetchScalarGridSpec(
            num_scalar_prefetch=0,
            grid=grid,
            in_specs=[
                pl.BlockSpec((tm, d_model), lambda i, j: (i, 0)),    # x
                pl.BlockSpec((d_model, tsae), lambda i, j: (0, j)),  # W_enc
                pl.BlockSpec((2, tsae), lambda i, j: (0, j)),        # [b_enc; thr]
                pl.BlockSpec((tsae, d_model), lambda i, j: (j, 0)),  # W_dec
                pl.BlockSpec((1, d_model), lambda i, j: (0, 0)),     # b_dec
            ],
            out_specs=pl.BlockSpec((tm, d_model), lambda i, j: (i, 0)),
        ),
        compiler_params=pltpu.CompilerParams(
            dimension_semantics=("parallel", "arbitrary"),
            vmem_limit_bytes=48 * 1024 * 1024),
    )(xq, w_enc_q, enc_vecs, w_dec_q, b_dec2)


def _reference(x, w_enc, b_enc, threshold, w_dec, b_dec, dtype=jnp.float32):
    """Pure-JAX reference matching the PyTorch module's forward."""
    pre = jnp.dot(x.astype(dtype), w_enc.astype(dtype),
                  preferred_element_type=jnp.float32) + b_enc
    acts = jnp.where(pre > threshold, jax.nn.relu(pre), 0.0)
    return jnp.dot(acts.astype(dtype), w_dec.astype(dtype),
                   preferred_element_type=jnp.float32) + b_dec


if __name__ == "__main__":
    d_model, d_sae, N = 128, 1024, 512   # small but exercises a (2, 2) grid

    key = jax.random.PRNGKey(0)
    kx, ke, kd, kt, kbe, kbd = jax.random.split(key, 6)

    # Deterministic synthetic parameters (module __init__ only fixes shapes).
    x = jax.random.normal(kx, (N, d_model), dtype=jnp.float32)
    w_enc = 0.05 * jax.random.normal(ke, (d_model, d_sae), dtype=jnp.float32)
    w_dec = 0.05 * jax.random.normal(kd, (d_sae, d_model), dtype=jnp.float32)
    threshold = 0.1 * jnp.abs(jax.random.normal(kt, (d_sae,), dtype=jnp.float32))
    b_enc = 0.1 * jax.random.normal(kbe, (d_sae,), dtype=jnp.float32)
    b_dec = 0.1 * jax.random.normal(kbd, (d_model,), dtype=jnp.float32)

    out = jumprelu_sae_forward(x, w_enc, b_enc, threshold, w_dec, b_dec)
    out = jax.block_until_ready(out)
    assert out.shape == (N, d_model)

    # Tight check vs a bf16-operand reference (same arithmetic as the kernel).
    ref_bf16 = _reference(x, w_enc, b_enc, threshold, w_dec, b_dec,
                          dtype=jnp.bfloat16)
    assert jnp.allclose(out, ref_bf16, atol=1e-2, rtol=1e-2), \
        "mismatch vs bf16-matched reference"

    # Loose check vs the exact f32 module semantics (bf16 rounding tolerance).
    ref_f32 = _reference(x, w_enc, b_enc, threshold, w_dec, b_dec)
    assert jnp.allclose(out, ref_f32, atol=5e-2, rtol=5e-2), \
        "mismatch vs f32 reference"

    print("KERNEL_OK")
</pallas_src>

<mosaic_0001>
module attributes {stable_mosaic.version = 11 : i64} {
  func.func @_sae_kernel(%arg0: i32, %arg1: i32, %arg2: memref<256x128xbf16, #tpu.memory_space<vmem>>, %arg3: memref<128x512xbf16, #tpu.memory_space<vmem>>, %arg4: memref<2x512xf32, #tpu.memory_space<vmem>>, %arg5: memref<512x128xbf16, #tpu.memory_space<vmem>>, %arg6: memref<1x128xf32, #tpu.memory_space<vmem>>, %arg7: memref<256x128xf32, #tpu.memory_space<vmem>>) attributes {dimension_semantics = [#tpu.dimension_semantics<parallel>, #tpu.dimension_semantics<arbitrary>], iteration_bounds = array<i64: 2, 2>, scalar_prefetch = 0 : i64, scratch_operands = 0 : i64, tpu.core_type = #tpu.core_type<tc>, window_params = [{transform_indices = @transform_0, window_bounds = array<i64: 256, 128>}, {transform_indices = @transform_1, window_bounds = array<i64: 128, 512>}, {transform_indices = @transform_2, window_bounds = array<i64: 2, 512>}, {transform_indices = @transform_3, window_bounds = array<i64: 512, 128>}, {pipeline_mode = #tpu.pipeline_mode<synchronous>, transform_indices = @transform_4, window_bounds = array<i64: 1, 128>}, {transform_indices = @transform_5, window_bounds = array<i64: 256, 128>}]} {
    %c0_i32 = arith.constant 0 : i32
    %0 = arith.cmpi eq, %arg1, %c0_i32 : i32
    %1 = arith.extui %0 : i1 to i32
    %c0_i32_0 = arith.constant 0 : i32
    %2 = arith.cmpi ne, %1, %c0_i32_0 : i32
    scf.if %2 {
      %c0_16 = arith.constant 0 : index
      %c0_17 = arith.constant 0 : index
      %22 = vector.load %arg6[%c0_16, %c0_17] : memref<1x128xf32, #tpu.memory_space<vmem>>, vector<1x128xf32>
      %23 = vector.shape_cast %22 : vector<1x128xf32> to vector<1x128xf32>
      %24 = vector.broadcast %23 : vector<1x128xf32> to vector<256x128xf32>
      %c0_18 = arith.constant 0 : index
      %c0_19 = arith.constant 0 : index
      %25 = vector.load %arg7[%c0_18, %c0_19] : memref<256x128xf32, #tpu.memory_space<vmem>>, vector<256x128xf32>
      tpu.vector_store %arg7[%c0_18, %c0_19], %24 {strides = array<i32>} : memref<256x128xf32, #tpu.memory_space<vmem>>, vector<256x128xf32>,
    } else {
    }
    %c0 = arith.constant 0 : index
    %c0_1 = arith.constant 0 : index
    %3 = vector.load %arg2[%c0, %c0_1] : memref<256x128xbf16, #tpu.memory_space<vmem>>, vector<256x128xbf16>
    %c0_2 = arith.constant 0 : index
    %c0_3 = arith.constant 0 : index
    %4 = vector.load %arg3[%c0_2, %c0_3] : memref<128x512xbf16, #tpu.memory_space<vmem>>, vector<128x512xbf16>
    %cst = arith.constant dense<0.000000e+00> : vector<256x512xf32>
    %5 = tpu.matmul %3, %4, %cst {dimension_numbers = #tpu.dot_dimension_numbers<[1], [0], [0], [1], [0, 0, 1, 1], [], []>} : vector<256x128xbf16>, vector<128x512xbf16>, vector<256x512xf32> -> vector<256x512xf32>
    %c0_4 = arith.constant 0 : index
    %c0_5 = arith.constant 0 : index
    %6 = vector.load %arg4[%c0_4, %c0_5] : memref<2x512xf32, #tpu.memory_space<vmem>>, vector<1x512xf32>
    %7 = vector.broadcast %6 : vector<1x512xf32> to vector<256x512xf32>
    %8 = arith.addf %5, %7 : vector<256x512xf32>
    %c1 = arith.constant 1 : index
    %c0_6 = arith.constant 0 : index
    %9 = vector.load %arg4[%c1, %c0_6] : memref<2x512xf32, #tpu.memory_space<vmem>>, vector<1x512xf32>
    %10 = vector.broadcast %9 : vector<1x512xf32> to vector<256x512xf32>
    %11 = arith.cmpf ogt, %8, %10 : vector<256x512xf32>
    %cst_7 = arith.constant 0.000000e+00 : f32
    %12 = vector.broadcast %cst_7 : f32 to vector<256x512xf32>
    %13 = arith.maximumf %8, %12 : vector<256x512xf32>
    %cst_8 = arith.constant 0.000000e+00 : f32
    %14 = vector.broadcast %cst_8 : f32 to vector<256x512xf32>
    %15 = arith.select %11, %13, %14 : vector<256x512xi1>, vector<256x512xf32>
    %c0_9 = arith.constant 0 : index
    %c0_10 = arith.constant 0 : index
    %16 = vector.load %arg7[%c0_9, %c0_10] : memref<256x128xf32, #tpu.memory_space<vmem>>, vector<256x128xf32>
    %17 = arith.truncf %15 : vector<256x512xf32> to vector<256x512xbf16>
    %c0_11 = arith.constant 0 : index
    %c0_12 = arith.constant 0 : index
    %18 = vector.load %arg5[%c0_11, %c0_12] : memref<512x128xbf16, #tpu.memory_space<vmem>>, vector<512x128xbf16>
    %cst_13 = arith.constant dense<0.000000e+00> : vector<256x128xf32>
    %19 = tpu.matmul %17, %18, %cst_13 {dimension_numbers = #tpu.dot_dimension_numbers<[1], [0], [0], [1], [0, 0, 1, 1], [], []>} : vector<256x512xbf16>, vector<512x128xbf16>, vector<256x128xf32> -> vector<256x128xf32>
    %20 = arith.addf %16, %19 : vector<256x128xf32>
    %c0_14 = arith.constant 0 : index
    %c0_15 = arith.constant 0 : index
    %21 = vector.load %arg7[%c0_14, %c0_15] : memref<256x128xf32, #tpu.memory_space<vmem>>, vector<256x128xf32>
    tpu.vector_store %arg7[%c0_14, %c0_15], %20 {strides = array<i32>} : memref<256x128xf32, #tpu.memory_space<vmem>>, vector<256x128xf32>,
    return
  }
  func.func @transform_0(%arg0: i32, %arg1: i32) -> (i32, i32) {
    %c0_i32 = arith.constant 0 : i32
    %c0_i32_0 = arith.constant 0 : i32
    return %arg0, %c0_i32 : i32, i32
  }
  func.func @transform_1(%arg0: i32, %arg1: i32) -> (i32, i32) {
    %c0_i32 = arith.constant 0 : i32
    %c0_i32_0 = arith.constant 0 : i32
    return %c0_i32, %arg1 : i32, i32
  }
  func.func @transform_2(%arg0: i32, %arg1: i32) -> (i32, i32) {
    %c0_i32 = arith.constant 0 : i32
    %c0_i32_0 = arith.constant 0 : i32
    return %c0_i32, %arg1 : i32, i32
  }
  func.func @transform_3(%arg0: i32, %arg1: i32) -> (i32, i32) {
    %c0_i32 = arith.constant 0 : i32
    %c0_i32_0 = arith.constant 0 : i32
    return %arg1, %c0_i32 : i32, i32
  }
  func.func @transform_4(%arg0: i32, %arg1: i32) -> (i32, i32) {
    %c0_i32 = arith.constant 0 : i32
    %c0_i32_0 = arith.constant 0 : i32
    %c0_i32_1 = arith.constant 0 : i32
    return %c0_i32, %c0_i32_0 : i32, i32
  }
  func.func @transform_5(%arg0: i32, %arg1: i32) -> (i32, i32) {
    %c0_i32 = arith.constant 0 : i32
    %c0_i32_0 = arith.constant 0 : i32
    return %arg0, %c0_i32 : i32, i32
  }
}

</mosaic_0001>

<bundles_post_ra>
// kernel: tpu_custom_call.1
= control target key start
LH: loop header
LB: loop body
LE: loop exit
PB: predicated region body
PF: predicated region fallthrough
CT: control target
= control target key end

     0   :  { %s4753_s0 = inlined_call_operand.hbm [shape: bf16[512,128], index: 0, kind: input, shape index: {}]   ;;  %s4754_s1 = inlined_call_operand.hbm [shape: bf16[128,1024], index: 1, kind: input, shape index: {}]   ;;  %s4755_s2 = inlined_call_operand.hbm [shape: f32[2,1024], index: 2, kind: input, shape index: {}]   ;;  %s4756_s3 = inlined_call_operand.hbm [shape: bf16[1024,128], index: 3, kind: input, shape index: {}]   ;;  %s4757_s4 = inlined_call_operand.vmem [shape: f32[1,128], index: 4, kind: input, shape index: {}]   ;;  %s4758_s5 = inlined_call_operand.hbm [shape: f32[512,128], index: 5, kind: output, shape index: {}]  }
   0x1   :  { %4775 = sst [smem:[#allocation24_spill]] %s4753_s0 }
   0x2   :  { %4776 = sst [smem:[#allocation25_spill]] %s4754_s1 }
   0x3   :  { %4777 = sst [smem:[#allocation26_spill]] %s4757_s4 }
   0x4   :  { %4778 = sst [smem:[#allocation27_spill]] %s4758_s5 }
   0x5   :  { %10 = vsyncpa [#allocation3], 0 }
   0x6   :  { %12 = vsyncpa [#allocation3 + $0x1], 0 }
   0x7   :  { %13 = vsyncpa [#allocation6], 0 }
   0x8   :  { %15 = vsyncpa [#allocation6 + $0x1], 0 }
   0x9   :  { %16 = vsyncpa [#allocation9], 0 }
   0xa   :  { %18 = vsyncpa [#allocation9 + $0x1], 0 }
   0xb   :  { %19 = vsyncpa [#allocation4], 0 }
   0xc   :  { %21 = vsyncpa [#allocation4 + $0x1], 0  ;;  %s3503_s18 = smov 0   ;;  %s3505_s19 = smov 0  }
   0xd   :  { %s3507_s20 = smov 0   ;;  %s3509_s21 = smov 0  }
   0xe   :  { %s3511_s22 = smov 0   ;;  %s3513_s23 = smov 0  }
   0xf   :  { %s3515_s24 = smov 0   ;;  %s3517_s25 = smov 0  }
  0x10   :  { %s3519_s26 = smov 0   ;;  %s3521_s27 = smov 0  }
  0x11   :  { %s3523_s28 = smov 0  }
  0x12 LB: > { %4779 = sst [smem:[#allocation15_spill]] %s3426_s20  ;;  %p4761_p0 = scmp.eq.s32.totalorder %s3458_s28, 0  ;;  %s3458_s28 = sphi %s3523_s28, %s27_s28   ;;  %s3454_s27 = sphi %s3521_s27, %s4880_s27   ;;  %s3450_s26 = sphi %s3519_s26, %s4887_s26   ;;  %s3446_s25 = sphi %s3517_s25, %s4886_s25   ;;  %s3442_s24 = sphi %s3515_s24, %s4885_s24   ;;  %s3438_s23 = sphi %s3513_s23, %s4877_s23   ;;  %s3434_s22 = sphi %s3511_s22, %s4884_s22   ;;  %s3430_s21 = sphi %s3509_s21, %s4883_s21   ;;  %s3426_s20 = sphi %s3507_s20, %s4875_s20   ;;  %s3422_s19 = sphi %s3505_s19, %s4882_s19   ;;  %s3418_s18 = sphi %s3503_s18, %s4881_s18  }
  0x13   : > { %4780 = sst [smem:[#allocation16_spill]] %s3438_s23  ;;  %p79_p1 = scmp.ne.s32.totalorder %s3426_s20, %s3422_s19 }
  0x14   : > { %4781 = sst [smem:[#allocation17_spill]] %s3446_s25  ;;  %p4760_p3 = scmp.lt.s32.totalorder %s3458_s28, 4 }
  0x15   : > { %4782 = sst [smem:[#allocation18_spill]] %s3454_s27  ;;  %p81_p4 = por %p79_p1, %p4761_p0 }
  0x16   : > { %s232_s30 = sand.u32 1, %s3458_s28   ;;  %s3569_s6 = sand.u32 1, %s3426_s20  }
  0x17   : > { %s4759_s7 = sshll.u32 %s3569_s6, 8  ;;  %s2759_s8 = sshll.u32 %s3450_s26, 8 }
  0x18   : > { %s4783_s1 = sld [smem:[#allocation25_spill]]  ;;  %s236_s12 = scalar_lea.vmem [#allocation5], %s4759_s7 }
  0x19   : > { %s243_s13 = sshll.u32 %s236_s12, 4  ;;  %p3582_p5 = pnand %p4760_p3, %p81_p4  ;;  %s3586_s13 = int_to_ptr.vmem [resolvable:$true] %s243_s13 }
  0x1a   : > { %s3589_s15 = scalar_lea.sflag [#allocation6], %s232_s30 }
  0x1b   : > { %s4784_s14 = scalar_select %p3582_p5, 1, 0 }
  0x1c   : > { %p3595_p8 = pneg %p3582_p5 }
  0x1e   : > { %s3576_s11 = scalar_lea.hbm %s4783_s1, %s2759_s8  ;;  %s3213_s10 = scalar_lea.hbm %s4783_s1, 8192 }
  0x1f   : > { %s3208_s16 = scalar_lea.hbm %s3576_s11, 4096  ;;  %p3214_p11 = scmp.lt.u32.totalorder %s3576_s11, %s4783_s1 }
  0x20   : > { %p3209_p7 = scmp.ne.s32.totalorder %s3576_s11, %s3208_s16  ;;  %p3215_p12 = scmp.lt.u32.totalorder %s3213_s10, %s3208_s16 }
  0x21   : > { %p3217_p1 = scmp.lt.u32.totalorder %s3208_s16, %s3576_s11 }
  0x22   : > { %p3211_p9 = pnand %p3595_p8, %p3209_p7  ;;  %p3216_p13 = por %p3215_p12, %p3214_p11 }
  0x24   : > { %p3212_p10 = pneg %p3211_p9  ;;  %p3218_p4 = por %p3217_p1, %p3216_p13 }
  0x26   : > { %p3219_p3 = pnand %p3218_p4, %p3212_p10 }
  0x28   : > { %3222 = shalt.err (!%p3219_p3)
}
  0x29   : > { %s3223_s30 = scalar_lea.vmem %s3586_s13, 4096  ;;  %s3460_s8 = smov [#allocation5]  }
  0x2a   : > { %p3224_p7 = scmp.ne.s32.totalorder %s3586_s13, %s3223_s30  ;;  %s3228_s9 = sshll.u32 %s3460_s8, 4  ;;  %s3229_s9 = int_to_ptr.vmem [resolvable:$false] %s3228_s9 }
  0x2b   : > { %s3230_s7 = scalar_lea.vmem %s3229_s9, 8192  ;;  %p3231_p0 = scmp.lt.s32.totalorder %s3586_s13, %s3229_s9 }
  0x2c   : > { %p3226_p9 = pnand %p3224_p7, %p3595_p8  ;;  %p3232_p6 = scmp.lt.s32.totalorder %s3230_s7, %s3223_s30 }
  0x2e   : > { %p3227_p2 = pneg %p3226_p9  ;;  %p3233_p11 = por %p3232_p6, %p3231_p0 }
  0x30   : > { %p3234_p12 = pnand %p3233_p11, %p3227_p2 }
  0x32   : > { %3237 = shalt.err (!%p3234_p12)
}
  0x33   : > { %s3461_s16 = smov 512   ;;  %s3462_s10 = smov 256  }
  0x34   : > { %s3463_s12 = smov 16   ;;  %p291_p0 = scmp.lt.s32.totalorder %s3458_s28, 5 }
  0x35   : > { %3003 = dma.hbm_to_vmem [thread:$0]  (!%p3582_p5), %s3576_s11, 4096, %s3586_s13, %s3589_s15, %s3461_s16, %s3462_s10, %s3463_s12  }
  0x36   : > { %p4786_p2 = scmp.ge.s32.totalorder %s3458_s28, 1  ;;  %s3627_s8 = sadd.s32 4294967295, %s3458_s28  }
  0x37   : > { %s2457_s9 = sadd.s32 4294967294, %s3458_s28   ;;  %s36_s7 = sadd.s32 1, %s3450_s26 }
  0x38   : > { %p3622_p3 = pnand %p4786_p2, %p291_p0  ;;  %s39_s29 = sadd.s32 1, %s3454_s27 }
  0x39   : > { %p37_p6 = scmp.ge.s32.totalorder %s36_s7, 2  ;;  %s46_s11 = sadd.s32 1, %s3438_s23 }
  0x3a   : > { %s4787_s30 = scalar_select %p3622_p3, 1, 0 }
  0x3b   : > { %p53_p10 = scmp.ne.s32.totalorder %s3438_s23, %s3434_s22  ;;  %p4763_p13 = scmp.ne.s32.totalorder %s3434_s22, %s3430_s21 }
  0x3c   : > { %s4889_s7 = smov (%p37_p6, %s36_s7), 0  ;;  %s4891_s29 = smov (!%p37_p6, %s39_s29), %s3454_s27 }
  0x3d   : > { %4788 = sst [smem:[#allocation19_spill]] %s4889_s7  ;;  %p4789_p1 = scmp.eq.s32.totalorder %s3458_s28, 0 }
  0x3e   : > { %p60_p7 = scmp.eq.s32.totalorder %s3627_s8, 0  ;;  %p41_p9 = scmp.ge.s32.totalorder %s4891_s29, 2 }
  0x3f   : > { %p3645_p4 = por %p4789_p1, %p53_p10  ;;  %s69_s16 = ssub.s32 %s3450_s26, %s4889_s7 }
  0x40   : > { %p3655_p11 = por %p60_p7, %p4763_p13  ;;  %p70_p12 = scmp.eq.s32.totalorder %s69_s16, 0 }
  0x41   : > { %s4893_s29 = smov (%p41_p9, %s4891_s29), 0  ;;  %s4793_s12 = sadd.s32 1, %s3426_s20 }
  0x42   : > { %s4791_s10 = scalar_select %p3655_p11, 1, 0 }
  0x43   : > { %4792 = sst [smem:[#allocation20_spill]] %s4893_s29  ;;  %s43_s5 = ssub.s32 %s3454_s27, %s4893_s29 }
  0x44   : > { %s3664_s1 = scalar_select %p70_p12, %s3426_s20, %s4793_s12  }
  0x45   : > { %p4795_p0 = scmp.ne.s32.totalorder %s3422_s19, %s3418_s18  ;;  %p44_p6 = scmp.eq.s32.totalorder %s43_s5, 0 }
  0x46   : > { %4794 = sst [smem:[#allocation21_spill]] %s3664_s1  ;;  %p182_p1 = scmp.eq.s32.totalorder %s3627_s8, 3 }
  0x47   : > { %p3671_p2 = por %p4795_p0, %p60_p7  ;;  %p188_p13 = scmp.eq.s32.totalorder %s2457_s9, 3 }
  0x48   : > { %s211_s7 = sand.u32 1, %s3438_s23   ;;  %p3683_p9 = por %p182_p1, %p53_p10 }
  0x49   : > { %s4796_s25 = scalar_select %p3671_p2, 1, 0 }
  0x4a   : > { %s3678_s16 = scalar_select %p44_p6, %s3438_s23, %s46_s11  }
  0x4b   : > { %s4798_s4 = scalar_select %p3683_p9, 1, 0 }
  0x4c   : > { %4797 = sst [smem:[#allocation22_spill]] %s3678_s16  ;;  %p4799_p12 = scmp.ne.s32.totalorder %s3434_s22, %s3430_s21 }
  0x4d   : > { %s2460_s18 = sshll.u32 %s211_s7, 7  ;;  %s2758_s29 = sshll.u32 %s3454_s27, 11 }
  0x4e   : > { %p3690_p11 = por %p188_p13, %p4799_p12  ;;  %s4802_s0 = sld [smem:[#allocation24_spill]] }
  0x4f   : > { %s215_s9 = scalar_lea.vmem [#allocation2], %s2460_s18  ;;  %p4803_p10 = scmp.lt.s32.totalorder %s3458_s28, 4 }
  0x50   : > { %s4800_s12 = scalar_select %p3690_p11, 1, 0 }
  0x51   : > { %s222_s11 = sshll.u32 %s215_s9, 4  ;;  %p3706_p13 = pnand %p4803_p10, %p3645_p4  ;;  %s3700_s11 = int_to_ptr.vmem [resolvable:$true] %s222_s11 }
  0x52   : > { %4801 = sst [smem:[#allocation23_spill]] %s4800_s12  ;;  %s2466_s27 = sshll.u32 %s3569_s6, 3 }
  0x53   : > { %s3711_s1 = scalar_lea.sflag [#allocation3], %s211_s7  ;;  %p3240_p0 = pneg %p3706_p13 }
  0x54   : > { %s3698_s5 = scalar_lea.hbm %s4802_s0, %s2758_s29  ;;  %s3243_s18 = scalar_lea.hbm %s4802_s0, 4096 }
  0x55   : > { %s3238_s20 = scalar_lea.hbm %s3698_s5, 2048  ;;  %p3244_p4 = scmp.lt.u32.totalorder %s3698_s5, %s4802_s0 }
  0x56   : > { %p3239_p7 = scmp.ne.s32.totalorder %s3698_s5, %s3238_s20  ;;  %p3245_p12 = scmp.lt.u32.totalorder %s3243_s18, %s3238_s20 }
  0x57   : > { %p3247_p11 = scmp.lt.u32.totalorder %s3238_s20, %s3698_s5 }
  0x58   : > { %p3241_p6 = pnand %p3240_p0, %p3239_p7  ;;  %p3246_p10 = por %p3245_p12, %p3244_p4 }
  0x5a   : > { %p3242_p1 = pneg %p3241_p6  ;;  %p3248_p9 = por %p3247_p11, %p3246_p10 }
  0x5c   : > { %p3249_p2 = pnand %p3248_p9, %p3242_p1 }
  0x5e   : > { %3252 = shalt.err (!%p3249_p2)
}
  0x5f   : > { %s3253_s7 = scalar_lea.vmem %s3700_s11, 2048  ;;  %s3464_s29 = smov [#allocation2]  }
  0x60   : > { %p3254_p7 = scmp.ne.s32.totalorder %s3700_s11, %s3253_s7  ;;  %s3258_s13 = sshll.u32 %s3464_s29, 4  ;;  %s3259_s13 = int_to_ptr.vmem [resolvable:$false] %s3258_s13 }
  0x61   : > { %s3260_s23 = scalar_lea.vmem %s3259_s13, 4096  ;;  %p3261_p5 = scmp.lt.s32.totalorder %s3700_s11, %s3259_s13 }
  0x62   : > { %p3256_p6 = pnand %p3254_p7, %p3240_p0  ;;  %p3262_p4 = scmp.lt.s32.totalorder %s3260_s23, %s3253_s7 }
  0x64   : > { %p3257_p3 = pneg %p3256_p6  ;;  %p3263_p12 = por %p3262_p4, %p3261_p5 }
  0x66   : > { %p3264_p11 = pnand %p3263_p12, %p3257_p3 }
  0x68   : > { %3267 = shalt.err (!%p3264_p11)
}
  0x69   : > { %s3465_s20 = smov 64   ;;  %s3466_s18 = smov 4  }
  0x6a   : > { %3000 = dma.hbm_to_vmem [thread:$0]  (!%p3706_p13), %s3698_s5, 2048, %s3700_s11, %s3711_s1, %s3465_s20, %s3465_s20, %s3466_s18  }
  0x6b   : > { %s2760_s9 = sshll.u32 %s3450_s26, 7  ;;  %s257_s23 = scalar_lea.vmem [#allocation7], %s2466_s27 }
  0x6c   : > { %s3746_s13 = scalar_lea.hbm %s4755_s2, %s2760_s9  ;;  %s265_s0 = sshll.u32 %s257_s23, 4  ;;  %s266_s0 = int_to_ptr.vmem [resolvable:$true] %s265_s0 }
  0x6d   : > { %s3268_s12 = scalar_lea.hbm %s3746_s13, 128  ;;  %s3273_s11 = scalar_lea.hbm %s4755_s2, 256 }
  0x6e   : > { %p3269_p5 = scmp.ne.s32.totalorder %s3746_s13, %s3268_s12  ;;  %p3274_p9 = scmp.lt.u32.totalorder %s3746_s13, %s4755_s2 }
  0x6f   : > { %p3275_p13 = scmp.lt.u32.totalorder %s3273_s11, %s3268_s12  ;;  %p3277_p1 = scmp.lt.u32.totalorder %s3268_s12, %s3746_s13 }
  0x70   : > { %p3271_p3 = pnand %p3269_p5, %p3595_p8 }
  0x71   : > { %p3276_p0 = por %p3275_p13, %p3274_p9 }
  0x72   : > { %p3272_p2 = pneg %p3271_p3 }
  0x73   : > { %p3278_p10 = por %p3277_p1, %p3276_p0 }
  0x75   : > { %p3279_p7 = pnand %p3278_p10, %p3272_p2 }
  0x77   : > { %3282 = shalt.err (!%p3279_p7)
}
  0x78   : > { %s3283_s27 = scalar_lea.vmem %s266_s0, 128  ;;  %s3467_s29 = smov [#allocation7]  }
  0x79   : > { %p3284_p6 = scmp.ne.s32.totalorder %s266_s0, %s3283_s27  ;;  %s3288_s7 = sshll.u32 %s3467_s29, 4  ;;  %s3289_s7 = int_to_ptr.vmem [resolvable:$false] %s3288_s7 }
  0x7a   : > { %s3290_s23 = scalar_lea.vmem %s3289_s7, 256  ;;  %p3291_p11 = scmp.lt.s32.totalorder %s266_s0, %s3289_s7 }
  0x7b   : > { %p3286_p4 = pnand %p3284_p6, %p3595_p8  ;;  %p3292_p5 = scmp.lt.s32.totalorder %s3290_s23, %s3283_s27 }
  0x7d   : > { %p3287_p12 = pneg %p3286_p4  ;;  %p3293_p3 = por %p3292_p5, %p3291_p11 }
  0x7f   : > { %p3294_p9 = pnand %p3293_p3, %p3287_p12 }
  0x81   : > { %3297 = shalt.err (!%p3294_p9)
}
  0x82   : > { %p4805_p13 = scmp.ne.s32.totalorder %s4784_s14, 0  ;;  %s2761_s12 = sshll.u32 %s3450_s26, 12 }
  0x83   : > { %s3772_s11 = scalar_lea.hbm %s4756_s3, %s2761_s12  ;;  %s4806_s1 = sshll.u32 %s3569_s6, 8 }
  0x84   : > { %3006 = dma.hbm_to_vmem [thread:$0]  (!%p4805_p13), %s3746_s13, 128, %s266_s0, %s3589_s15  }
  0x85   : > { %s276_s9 = scalar_lea.vmem [#allocation8], %s4806_s1  ;;  %s273_s29 = scalar_lea.sflag [#allocation9], %s3569_s6 }
  0x86   : > { %s283_s27 = sshll.u32 %s276_s9, 4  ;;  %s3298_s7 = scalar_lea.hbm %s3772_s11, 4096  ;;  %s3776_s27 = int_to_ptr.vmem [resolvable:$true] %s283_s27 }
  0x87   : > { %p3299_p2 = scmp.ne.s32.totalorder %s3772_s11, %s3298_s7  ;;  %s3303_s13 = scalar_lea.hbm %s4756_s3, 8192 }
  0x88   : > { %p3304_p10 = scmp.lt.u32.totalorder %s3772_s11, %s4756_s3  ;;  %p3305_p7 = scmp.lt.u32.totalorder %s3303_s13, %s3298_s7 }
  0x89   : > { %p3301_p0 = pnand %p3299_p2, %p3595_p8  ;;  %p3307_p4 = scmp.lt.u32.totalorder %s3298_s7, %s3772_s11 }
  0x8a   : > { %p3306_p6 = por %p3305_p7, %p3304_p10 }
  0x8b   : > { %p3302_p1 = pneg %p3301_p0 }
  0x8c   : > { %p3308_p12 = por %p3307_p4, %p3306_p6 }
  0x8e   : > { %p3309_p11 = pnand %p3308_p12, %p3302_p1 }
  0x90   : > { %3312 = shalt.err (!%p3309_p11)
}
  0x91   : > { %s3313_s16 = scalar_lea.vmem %s3776_s27, 4096  ;;  %s3468_s5 = smov [#allocation8]  }
  0x92   : > { %p3314_p5 = scmp.ne.s32.totalorder %s3776_s27, %s3313_s16  ;;  %s3318_s1 = sshll.u32 %s3468_s5, 4  ;;  %s3319_s1 = int_to_ptr.vmem [resolvable:$false] %s3318_s1 }
  0x93   : > { %s3320_s9 = scalar_lea.vmem %s3319_s1, 8192  ;;  %p3321_p2 = scmp.lt.s32.totalorder %s3776_s27, %s3319_s1 }
  0x94   : > { %p3316_p3 = pnand %p3314_p5, %p3595_p8  ;;  %p3322_p0 = scmp.lt.s32.totalorder %s3320_s9, %s3313_s16 }
  0x96   : > { %p3317_p9 = pneg %p3316_p3  ;;  %p3323_p10 = por %p3322_p0, %p3321_p2 }
  0x98   : > { %p3324_p7 = pnand %p3323_p10, %p3317_p9 }
  0x9a   : > { %3327 = shalt.err (!%p3324_p7)
}
  0x9b   : > { %3009 = dma.hbm_to_vmem [thread:$0]  (!%p4805_p13), %s3772_s11, 4096, %s3776_s27, %s273_s29, %s3465_s20, %s3465_s20, %s3466_s18  }
  0x9c   : > { %p4807_p8 = scmp.ne.s32.totalorder %s4787_s30, 0 }
  0x9d   : > { %s3808_s17 = sand.u32 (!%p4807_p8), 1, %s3434_s22   ;;  %p4808_p1 = scmp.ne.s32.totalorder (!%p4807_p8), %s4791_s10, 0 }
  0x9e   : > { %295 = sbr.rel (%p4807_p8) target bundleno = 812 (0x32c), region = 40  ;;  %s2473_s7 = sshll.u32 (!%p4807_p8), %s3808_s17, 7 }
  0x9f   : > { %s298_s0 = scalar_lea.sflag (!%p4807_p8), [#allocation3], %s3808_s17  ;;  %s3812_s14 = scalar_lea.vmem (!%p4807_p8), [#allocation2], %s2473_s7 }
  0xa5   : > { %3401 = dma.done.wait (%p4808_p1), %s298_s0, 2048  }
  0xa6   : > { %3403 = vsyncadd (%p4808_p1), %s298_s0, 4294965248  ;;  %s306_s6 = sand.u32 1, %s3627_s8   ;;  %s308_s30 = sand.u32 1, %s3422_s19  }
  0xa7   : > { %s2474_s20 = sshll.u32 %s308_s30, 8  ;;  %s307_s18 = scalar_lea.sflag [#allocation6], %s306_s6 }
  0xa8   : > { %s3820_s11 = scalar_lea.vmem [#allocation5], %s2474_s20  ;;  %p4809_p13 = scmp.ne.s32.totalorder %s4796_s25, 0 }
  0xaa   : > { %3405 = dma.done.wait (%p4809_p13), %s307_s18, 4224  }
  0xab   : > { %3407 = vsyncadd (%p4809_p13), %s307_s18, 4294963072  ;;  %s2475_s27 = sshll.u32 %s308_s30, 3  ;;  %s325_s10 = scalar_lea.sflag [#allocation9], %s308_s30 }
  0xac   : > { %s3826_s29 = scalar_lea.vmem [#allocation7], %s2475_s27  ;;  %s3828_s15 = scalar_lea.vmem [#allocation8], %s2474_s20 }
  0xad   : > { %3409 = dma.done.wait (%p4809_p13), %s325_s10, 4096  }
  0xae   : > { %3411 = vsyncadd (%p4809_p13), %s325_s10, 4294963200  ;;  %s2477_s8 = sshll.u32 %s3808_s17, 8  ;;  %p2478_p6 = scmp.ne.s32.totalorder %s3442_s24, 0 }
  0xaf   : > { %s3835_s13 = scalar_lea.vmem [#allocation10], %s2477_s8  ;;  %s4810_s16 = sld [smem:[#allocation26_spill]] (!%p2478_p6) }
  0xb0   : > { %379 = sbr.rel (%p2478_p6) target bundleno = 198 (0xc6), region = 60 }
  0xb5   : > { %v2479_v0 = vld [vmem:[%s4810_s16] ss:$0 sm:$0xff] (!%p2478_p6) }
  0xb6   : > { %387 = vst [vmem:[%s3835_s13] sm:$0xff] (!%p2478_p6), %v2479_v0  ;;  %388 = vst [vmem:[%s3835_s13 + $0x8] sm:$0xff] (!%p2478_p6), %v2479_v0 }
  0xb7   : > { %389 = vst [vmem:[%s3835_s13 + $0x10] sm:$0xff] %v2479_v0  ;;  %390 = vst [vmem:[%s3835_s13 + $0x18] sm:$0xff] %v2479_v0 }
  0xb8   : > { %391 = vst [vmem:[%s3835_s13 + $0x20] sm:$0xff] %v2479_v0  ;;  %392 = vst [vmem:[%s3835_s13 + $0x28] sm:$0xff] %v2479_v0 }
  0xb9   : > { %393 = vst [vmem:[%s3835_s13 + $0x30] sm:$0xff] %v2479_v0  ;;  %394 = vst [vmem:[%s3835_s13 + $0x38] sm:$0xff] %v2479_v0 }
  0xba   : > { %395 = vst [vmem:[%s3835_s13 + $0x40] sm:$0xff] %v2479_v0  ;;  %396 = vst [vmem:[%s3835_s13 + $0x48] sm:$0xff] %v2479_v0 }
  0xbb   : > { %397 = vst [vmem:[%s3835_s13 + $0x50] sm:$0xff] %v2479_v0  ;;  %398 = vst [vmem:[%s3835_s13 + $0x58] sm:$0xff] %v2479_v0 }
  0xbc   : > { %399 = vst [vmem:[%s3835_s13 + $0x60] sm:$0xff] %v2479_v0  ;;  %400 = vst [vmem:[%s3835_s13 + $0x68] sm:$0xff] %v2479_v0 }
  0xbd   : > { %401 = vst [vmem:[%s3835_s13 + $0x70] sm:$0xff] %v2479_v0  ;;  %402 = vst [vmem:[%s3835_s13 + $0x78] sm:$0xff] %v2479_v0 }
  0xbe   : > { %403 = vst [vmem:[%s3835_s13 + $0x80] sm:$0xff] %v2479_v0  ;;  %404 = vst [vmem:[%s3835_s13 + $0x88] sm:$0xff] %v2479_v0 }
  0xbf   : > { %405 = vst [vmem:[%s3835_s13 + $0x90] sm:$0xff] %v2479_v0  ;;  %406 = vst [vmem:[%s3835_s13 + $0x98] sm:$0xff] %v2479_v0 }
  0xc0   : > { %407 = vst [vmem:[%s3835_s13 + $0xa0] sm:$0xff] %v2479_v0  ;;  %408 = vst [vmem:[%s3835_s13 + $0xa8] sm:$0xff] %v2479_v0 }
  0xc1   : > { %409 = vst [vmem:[%s3835_s13 + $0xb0] sm:$0xff] %v2479_v0  ;;  %410 = vst [vmem:[%s3835_s13 + $0xb8] sm:$0xff] %v2479_v0 }
  0xc2   : > { %411 = vst [vmem:[%s3835_s13 + $0xc0] sm:$0xff] %v2479_v0  ;;  %412 = vst [vmem:[%s3835_s13 + $0xc8] sm:$0xff] %v2479_v0 }
  0xc3   : > { %413 = vst [vmem:[%s3835_s13 + $0xd0] sm:$0xff] %v2479_v0  ;;  %414 = vst [vmem:[%s3835_s13 + $0xd8] sm:$0xff] %v2479_v0 }
  0xc4   : > { %415 = vst [vmem:[%s3835_s13 + $0xe0] sm:$0xff] %v2479_v0  ;;  %416 = vst [vmem:[%s3835_s13 + $0xe8] sm:$0xff] %v2479_v0 }
  0xc5   : > { %417 = vst [vmem:[%s3835_s13 + $0xf0] sm:$0xff] %v2479_v0  ;;  %418 = vst [vmem:[%s3835_s13 + $0xf8] sm:$0xff] %v2479_v0 }
  0xc6 PF: > { %v3112_v1 = vld [vmem:[%s3820_s11 + $0x4] ss:$16 sps:$4 sm:$0xff]   ;;  %v3114_v2 = vld [vmem:[%s3820_s11 + $0xc] ss:$16 sps:$4 sm:$0xff]   ;;  %v3469_v3 = vmov 0   ;;  %s4869_s24 = sld [smem:[#allocation17_spill]] }
  0xc7   : > { %793 = vmatprep.mubr.bf16.mxu0 %v3469_v3  ;;  %986 = vmatprep.mubr.bf16.mxu1 %v3469_v3  ;;  %v3116_v4 = vld [vmem:[%s3820_s11] ss:$16 sps:$4 sm:$0xff]   ;;  %v3117_v5 = vld [vmem:[%s3820_s11 + $0x8] ss:$16 sps:$4 sm:$0xff]   ;;  %v3118_v6 = vld [vmem:[%s3820_s11 + $0x24] ss:$16 sps:$4 sm:$0xff]  }
  0xc8   : > { %761 = vmatprep.subr.bf16.mxu0 %v3112_v1  ;;  %954 = vmatprep.subr.bf16.mxu1 %v3114_v2  ;;  %v3120_v7 = vld [vmem:[%s3820_s11 + $0x2c] ss:$16 sps:$4 sm:$0xff]   ;;  %v3122_v8 = vld [vmem:[%s3820_s11 + $0x20] ss:$16 sps:$4 sm:$0xff]   ;;  %v3123_v9 = vld [vmem:[%s3820_s11 + $0x28] ss:$16 sps:$4 sm:$0xff]  }
  0xc9   : > { %762 = vmatpush1.bf16.msra.mxu0 %v3116_v4  ;;  %955 = vmatpush1.bf16.msra.mxu1 %v3117_v5  ;;  %v3124_v10 = vld [vmem:[%s3820_s11 + $0x44] ss:$16 sps:$4 sm:$0xff]   ;;  %v3126_v11 = vld [vmem:[%s3820_s11 + $0x4c] ss:$16 sps:$4 sm:$0xff]   ;;  %v3128_v12 = vld [vmem:[%s3820_s11 + $0x40] ss:$16 sps:$4 sm:$0xff]  }
  0xca   : > { %763 = vmatprep.subr.bf16.mxu0 %v3118_v6  ;;  %956 = vmatprep.subr.bf16.mxu1 %v3120_v7  ;;  %v3129_v13 = vld [vmem:[%s3820_s11 + $0x48] ss:$16 sps:$4 sm:$0xff]   ;;  %v3130_v14 = vld [vmem:[%s3820_s11 + $0x64] ss:$16 sps:$4 sm:$0xff]   ;;  %v3132_v15 = vld [vmem:[%s3820_s11 + $0x6c] ss:$16 sps:$4 sm:$0xff]  }
  0xcb   : > { %v3134_v16 = vld [vmem:[%s3820_s11 + $0x60] ss:$16 sps:$4 sm:$0xff]   ;;  %v3135_v17 = vld [vmem:[%s3820_s11 + $0x68] ss:$16 sps:$4 sm:$0xff]   ;;  %v3136_v18 = vld [vmem:[%s3820_s11 + $0x84] ss:$16 sps:$4 sm:$0xff]  }
  0xcc   : > { %v3138_v19 = vld [vmem:[%s3820_s11 + $0x8c] ss:$16 sps:$4 sm:$0xff]   ;;  %v3140_v20 = vld [vmem:[%s3820_s11 + $0x80] ss:$16 sps:$4 sm:$0xff]   ;;  %v3141_v21 = vld [vmem:[%s3820_s11 + $0x88] ss:$16 sps:$4 sm:$0xff]  }
  0xcd   : > { %764 = vmatpush1.bf16.msra.mxu0 %v3122_v8  ;;  %957 = vmatpush1.bf16.msra.mxu1 %v3123_v9  ;;  %v3142_v22 = vld [vmem:[%s3820_s11 + $0xa4] ss:$16 sps:$4 sm:$0xff]   ;;  %v3144_v23 = vld [vmem:[%s3820_s11 + $0xac] ss:$16 sps:$4 sm:$0xff]   ;;  %v3146_v24 = vld [vmem:[%s3820_s11 + $0xa0] ss:$16 sps:$4 sm:$0xff]  }
  0xce   : > { %765 = vmatprep.subr.bf16.mxu0 %v3124_v10  ;;  %958 = vmatprep.subr.bf16.mxu1 %v3126_v11  ;;  %v3147_v25 = vld [vmem:[%s3820_s11 + $0xa8] ss:$16 sps:$4 sm:$0xff]   ;;  %v3148_v26 = vld [vmem:[%s3820_s11 + $0xc4] ss:$16 sps:$4 sm:$0xff]   ;;  %v3150_v27 = vld [vmem:[%s3820_s11 + $0xcc] ss:$16 sps:$4 sm:$0xff]  }
  0xcf   : > { %v3152_v28 = vld [vmem:[%s3820_s11 + $0xc0] ss:$16 sps:$4 sm:$0xff]   ;;  %v3153_v29 = vld [vmem:[%s3820_s11 + $0xc8] ss:$16 sps:$4 sm:$0xff]   ;;  %v3154_v30 = vld [vmem:[%s3820_s11 + $0xe4] ss:$16 sps:$4 sm:$0xff]  }
  0xd0   : > { %v3156_v31 = vld [vmem:[%s3820_s11 + $0xec] ss:$16 sps:$4 sm:$0xff]   ;;  %v3158_v32 = vld [vmem:[%s3820_s11 + $0xe0] ss:$16 sps:$4 sm:$0xff]   ;;  %v3159_v33 = vld [vmem:[%s3820_s11 + $0xe8] ss:$16 sps:$4 sm:$0xff]  }
  0xd1   : > { %766 = vmatpush1.bf16.msra.mxu0 %v3128_v12  ;;  %959 = vmatpush1.bf16.msra.mxu1 %v3129_v13  ;;  %v3160_v34 = vld [vmem:[%s3812_s14] sm:$0xff]   ;;  %v3172_v35 = vld [vmem:[%s3828_s15 + $0x40] sm:$0xff]   ;;  %v3161_v39 = vld [vmem:[%s3812_s14 + $0x8] sm:$0xff]   ;;  %s2762_s25 = sshll.u32 %s4869_s24, 12  ;;  %s2306_s5 = sshll.u32 %s3835_s13, 4  ;;  %s4688_s5 = int_to_ptr.vmem [resolvable:$true] %s2306_s5 }
  0xd2   : > { %767 = vmatprep.subr.bf16.mxu0 %v3130_v14  ;;  %960 = vmatprep.subr.bf16.mxu1 %v3132_v15  ;;  %v3173_v36 = vld [vmem:[%s3828_s15 + $0xc0] sm:$0xff]   ;;  %v3178_v40 = vld [vmem:[%s3828_s15 + $0x48] sm:$0xff]   ;;  %v3184_v45 = vld [vmem:[%s3828_s15 + $0x50] sm:$0xff]   ;;  %s4870_s7 = sld [smem:[#allocation27_spill]]  ;;  %s3328_s6 = scalar_lea.vmem %s4688_s5, 4096 }
  0xd3   : > { %v3174_v37 = vld [vmem:[%s3828_s15] sm:$0xff]   ;;  %v3179_v41 = vld [vmem:[%s3828_s15 + $0xc8] sm:$0xff]   ;;  %v3185_v46 = vld [vmem:[%s3828_s15 + $0xd0] sm:$0xff]   ;;  %p3329_p4 = scmp.ne.s32.totalorder %s4688_s5, %s3328_s6  ;;  %p4871_p12 = scmp.ne.s32.totalorder %s4798_s4, 0 }
  0xd4   : > { %v3175_v38 = vld [vmem:[%s3828_s15 + $0x80] sm:$0xff]   ;;  %v3180_v42 = vld [vmem:[%s3828_s15 + $0x8] sm:$0xff]   ;;  %v3186_v47 = vld [vmem:[%s3828_s15 + $0x10] sm:$0xff]   ;;  %s3470_s30 = smov [#allocation10]  }
  0xd5   : > { %768 = vmatpush1.bf16.msra.mxu0 %v3134_v16  ;;  %961 = vmatpush1.bf16.msra.mxu1 %v3135_v17  ;;  %v3181_v43 = vld [vmem:[%s3828_s15 + $0x88] sm:$0xff]   ;;  %v3162_v44 = vld [vmem:[%s3812_s14 + $0x10] sm:$0xff]   ;;  %v3187_v48 = vld [vmem:[%s3828_s15 + $0x90] sm:$0xff]   ;;  %p3330_p11 = pnand %p3329_p4, %p4871_p12  ;;  %s3332_s20 = sshll.u32 %s3470_s30, 4  ;;  %s3333_s20 = int_to_ptr.vmem [resolvable:$false] %s3332_s20 }
  0xd6   : > { %769 = vmatprep.subr.bf16.mxu0 %v3136_v18  ;;  %962 = vmatprep.subr.bf16.mxu1 %v3138_v19  ;;  %v3188_v49 = vld [vmem:[%s3828_s15 + $0x58] sm:$0xff]   ;;  %v3163_v52 = vld [vmem:[%s3812_s14 + $0x18] sm:$0xff]   ;;  %v3192_v54 = vld [vmem:[%s3828_s15 + $0x60] sm:$0xff]   ;;  %v485_v19 = vlaneseq  ;;  %s3334_s18 = scalar_lea.vmem %s3333_s20, 8192  ;;  %p3335_p3 = scmp.lt.s32.totalorder %s4688_s5, %s3333_s20 }
  0xd7   : > { %v3189_v50 = vld [vmem:[%s3828_s15 + $0xd8] sm:$0xff]   ;;  %v3193_v55 = vld [vmem:[%s3828_s15 + $0xe0] sm:$0xff]   ;;  %v3196_v58 = vld [vmem:[%s3828_s15 + $0x68] sm:$0xff]   ;;  %p3331_p5 = pneg %p3330_p11  ;;  %p3336_p9 = scmp.lt.s32.totalorder %s3334_s18, %s3328_s6 }
  0xd8   : > { %v3190_v51 = vld [vmem:[%s3828_s15 + $0x18] sm:$0xff]   ;;  %v3194_v56 = vld [vmem:[%s3828_s15 + $0x20] sm:$0xff]   ;;  %v3197_v59 = vld [vmem:[%s3828_s15 + $0xe8] sm:$0xff]   ;;  %s4686_s0 = scalar_lea.hbm %s4870_s7, %s2762_s25 }
  0xd9   : > { %770 = vmatpush1.bf16.msra.mxu0 %v3140_v20  ;;  %963 = vmatpush1.bf16.msra.mxu1 %v3141_v21  ;;  %v3191_v53 = vld [vmem:[%s3828_s15 + $0x98] sm:$0xff]   ;;  %v3195_v57 = vld [vmem:[%s3828_s15 + $0xa0] sm:$0xff]   ;;  %v3198_v60 = vld [vmem:[%s3828_s15 + $0x28] sm:$0xff]   ;;  %v486_v20 = vshrl.u32 %v485_v19, 7  ;;  %p3337_p2 = por %p3336_p9, %p3335_p3 }
  0xda   : > { %771 = vmatprep.subr.bf16.mxu0 %v3142_v22  ;;  %964 = vmatprep.subr.bf16.mxu1 %v3144_v23  ;;  %v3164_v61 = vld [vmem:[%s3812_s14 + $0x20] sm:$0xff]   ;;  %v3199_v62 = vld [vmem:[%s3828_s15 + $0xa8] sm:$0xff]   ;;  %v3204_v4 = vld [vmem:[%s3828_s15 + $0x78] sm:$0xff]  }
  0xdb   : > { %v3200_v63 = vld [vmem:[%s3828_s15 + $0x70] sm:$0xff]   ;;  %v3205_v5 = vld [vmem:[%s3828_s15 + $0xf8] sm:$0xff]   ;;  %v3166_v9 = vld [vmem:[%s3812_s14 + $0x30] sm:$0xff]   ;;  %v487_v21 = vsub.s32 0, %v486_v20  ;;  %v495_v22 = vsub.s32 2, %v486_v20  ;;  %p3338_p0 = pnand %p3337_p2, %p3331_p5 }
  0xdc   : > { %v3201_v0 = vld [vmem:[%s3828_s15 + $0xf0] sm:$0xff]   ;;  %v3206_v6 = vld [vmem:[%s3828_s15 + $0x38] sm:$0xff]   ;;  %v3167_v10 = vld [vmem:[%s3812_s14 + $0x38] sm:$0xff]  }
  0xdd   : > { %772 = vmatpush1.bf16.msra.mxu0 %v3146_v24  ;;  %965 = vmatpush1.bf16.msra.mxu1 %v3147_v25  ;;  %v3202_v1 = vld [vmem:[%s3828_s15 + $0x30] sm:$0xff]   ;;  %v3207_v7 = vld [vmem:[%s3828_s15 + $0xb8] sm:$0xff]   ;;  %v3170_v13 = vld [vmem:[%s3812_s14 + $0x50] sm:$0xff]   ;;  %v491_v24 = vsub.s32 1, %v486_v20  ;;  %v499_v25 = vsub.s32 3, %v486_v20 }
  0xde   : > { %773 = vmatprep.subr.bf16.mxu0 %v3148_v26  ;;  %966 = vmatprep.subr.bf16.mxu1 %v3150_v27  ;;  %v3203_v2 = vld [vmem:[%s3828_s15 + $0xb0] sm:$0xff]   ;;  %v3165_v8 = vld [vmem:[%s3812_s14 + $0x28] sm:$0xff]   ;;  %v3171_v14 = vld [vmem:[%s3812_s14 + $0x58] sm:$0xff]  }
  0xdf   : > { %v3168_v11 = vld [vmem:[%s3812_s14 + $0x40] sm:$0xff]   ;;  %v3169_v12 = vld [vmem:[%s3812_s14 + $0x48] sm:$0xff]   ;;  %v3182_v17 = vld [vmem:[%s3812_s14 + $0x70] sm:$0xff]  }
  0xe0   : > { %v3176_v15 = vld [vmem:[%s3812_s14 + $0x60] sm:$0xff]   ;;  %v3177_v16 = vld [vmem:[%s3812_s14 + $0x68] sm:$0xff]   ;;  %v3183_v18 = vld [vmem:[%s3812_s14 + $0x78] sm:$0xff]   ;;  %s2293_s14 = scalar_lea.sflag [#allocation4], %s3808_s17 }
  0xe1   : > { %774 = vmatpush1.bf16.msra.mxu0 %v3152_v28  ;;  %967 = vmatpush1.bf16.msra.mxu1 %v3153_v29  ;;  %v483_v23 = vld [vmem:[%s3826_s29] ss:$2 sm:$0xf]  ;;  %v2528_v27 = vld [vmem:[%s3826_s29 + $0x1] ss:$2 sm:$0xf] }
  0xe2   : > { %775 = vmatprep.subr.bf16.mxu0 %v3154_v30  ;;  %968 = vmatprep.subr.bf16.mxu1 %v3156_v31  ;;  %v3986_v26 = vrot.slane %v483_v23, %v487_v21  ;;  %v3989_v28 = vrot.slane %v483_v23, %v495_v22  ;;  %v3991_v29 = vrot.slane %v483_v23, %v491_v24 }
  0xe3   : > { %v3993_v30 = vrot.slane %v483_v23, %v499_v25  ;;  %v3995_v31 = vrot.slane %v2528_v27, %v487_v21 }
  0xe5   : > { %776 = vmatpush1.bf16.msra.mxu0 %v3158_v32  ;;  %969 = vmatpush1.bf16.msra.mxu1 %v3159_v33  ;;  %v3997_v33 = vrot.slane %v2528_v27, %v495_v22 }
  0xe6   : > { %2763 = vmatprep.subr.bf16.mxu0 %v3172_v35  ;;  %2875 = vmatprep.subr.bf16.mxu1 %v3173_v36 }
  0xe8   : > { %794 = vmatmul.mubr.bf16.vlgmr.msra.gmra.mrb[0].mxu0 %v3160_v34  ;;  %987 = vmatmul.mubr.bf16.vlgmr.msra.gmra.mrb[0].mxu1 %v3160_v34 }
  0xe9   : > { %803 = vmatprep.mubr.bf16.mxu0 %v3469_v3  ;;  %996 = vmatprep.mubr.bf16.mxu1 %v3469_v3 }
  0xea   : > { %2764 = vmatpush3.bf16.msra.mxu0 %v3174_v37  ;;  %2876 = vmatpush3.bf16.msra.mxu1 %v3175_v38 }
  0xeb   : > { %2765 = vmatprep.subr.bf16.mxu0 %v3178_v40  ;;  %2877 = vmatprep.subr.bf16.mxu1 %v3179_v41  ;;  %v4005_v41 = vrot.slane %v2528_v27, %v499_v25 }
  0xee   : > { %2766 = vmatpush3.bf16.msra.mxu0 %v3180_v42  ;;  %2878 = vmatpush3.bf16.msra.mxu1 %v3181_v43 }
  0xef   : > { %2767 = vmatprep.subr.bf16.mxu0 %v3184_v45  ;;  %2879 = vmatprep.subr.bf16.mxu1 %v3185_v46 }
  0xf0   : > { %804 = vmatmul.mubr.bf16.gmra.mrb[4].mxu0 %v3161_v39  ;;  %997 = vmatmul.mubr.bf16.gmra.mrb[4].mxu1 %v3161_v39  ;;  %v4002_v39 = vrot.slane %v2528_v27, %v491_v24 }
  0xf1   : > { %813 = vmatprep.mubr.bf16.mxu0 %v3469_v3  ;;  %1006 = vmatprep.mubr.bf16.mxu1 %v3469_v3 }
  0xf2   : > { %2768 = vmatpush3.bf16.msra.mxu0 %v3186_v47  ;;  %2880 = vmatpush3.bf16.msra.mxu1 %v3187_v48 }
  0xf3   : > { %2769 = vmatprep.subr.bf16.mxu0 %v3188_v49  ;;  %2881 = vmatprep.subr.bf16.mxu1 %v3189_v50 }
  0xf6   : > { %2770 = vmatpush3.bf16.msra.mxu0 %v3190_v51  ;;  %2882 = vmatpush3.bf16.msra.mxu1 %v3191_v53 }
  0xf7   : > { %2771 = vmatprep.subr.bf16.mxu0 %v3192_v54  ;;  %2883 = vmatprep.subr.bf16.mxu1 %v3193_v55 }
  0xf8   : > { %814 = vmatmul.mubr.bf16.gmra.mrb[8].mxu0 %v3162_v44  ;;  %1007 = vmatmul.mubr.bf16.gmra.mrb[8].mxu1 %v3162_v44 }
  0xf9   : > { %823 = vmatprep.mubr.bf16.mxu0 %v3469_v3  ;;  %1016 = vmatprep.mubr.bf16.mxu1 %v3469_v3 }
  0xfa   : > { %2772 = vmatpush3.bf16.msra.mxu0 %v3194_v56  ;;  %2884 = vmatpush3.bf16.msra.mxu1 %v3195_v57 }
  0xfb   : > { %2773 = vmatprep.subr.bf16.mxu0 %v3196_v58  ;;  %2885 = vmatprep.subr.bf16.mxu1 %v3197_v59 }
  0xfe   : > { %2774 = vmatpush3.bf16.msra.mxu0 %v3198_v60  ;;  %2886 = vmatpush3.bf16.msra.mxu1 %v3199_v62 }
  0xff   : > { %2775 = vmatprep.subr.bf16.mxu0 %v3200_v63  ;;  %2887 = vmatprep.subr.bf16.mxu1 %v3201_v0 }
 0x100   : > { %824 = vmatmul.mubr.bf16.gmra.mrb[12].mxu0 %v3163_v52  ;;  %1017 = vmatmul.mubr.bf16.gmra.mrb[12].mxu1 %v3163_v52 }
 0x101   : > { %833 = vmatprep.mubr.bf16.mxu0 %v3469_v3  ;;  %1026 = vmatprep.mubr.bf16.mxu1 %v3469_v3 }
 0x102   : > { %2776 = vmatpush3.bf16.msra.mxu0 %v3202_v1  ;;  %2888 = vmatpush3.bf16.msra.mxu1 %v3203_v2 }
 0x103   : > { %2777 = vmatprep.subr.bf16.mxu0 %v3204_v4  ;;  %2889 = vmatprep.subr.bf16.mxu1 %v3205_v5 }
 0x106   : > { %2778 = vmatpush3.bf16.msra.mxu0 %v3206_v6  ;;  %2890 = vmatpush3.bf16.msra.mxu1 %v3207_v7 }
 0x108   : > { %834 = vmatmul.mubr.bf16.gmra.mrb[16].mxu0 %v3164_v61  ;;  %1027 = vmatmul.mubr.bf16.gmra.mrb[16].mxu1 %v3164_v61 }
 0x109   : > { %843 = vmatprep.mubr.bf16.mxu0 %v3469_v3  ;;  %1036 = vmatprep.mubr.bf16.mxu1 %v3469_v3 }
 0x110   : > { %844 = vmatmul.mubr.bf16.gmra.mrb[20].mxu0 %v3165_v8  ;;  %1037 = vmatmul.mubr.bf16.gmra.mrb[20].mxu1 %v3165_v8 }
 0x111   : > { %853 = vmatprep.mubr.bf16.mxu0 %v3469_v3  ;;  %1046 = vmatprep.mubr.bf16.mxu1 %v3469_v3 }
 0x118   : > { %854 = vmatmul.mubr.bf16.gmra.mrb[24].mxu0 %v3166_v9  ;;  %1047 = vmatmul.mubr.bf16.gmra.mrb[24].mxu1 %v3166_v9 }
 0x119   : > { %863 = vmatprep.mubr.bf16.mxu0 %v3469_v3  ;;  %1056 = vmatprep.mubr.bf16.mxu1 %v3469_v3 }
 0x120   : > { %864 = vmatmul.mubr.bf16.gmra.mrb[28].mxu0 %v3167_v10  ;;  %1057 = vmatmul.mubr.bf16.gmra.mrb[28].mxu1 %v3167_v10 }
 0x121   : > { %873 = vmatprep.mubr.bf16.mxu0 %v3469_v3  ;;  %1066 = vmatprep.mubr.bf16.mxu1 %v3469_v3 }
 0x128   : > { %874 = vmatmul.mubr.bf16.gmra.mrb[32].mxu0 %v3168_v11  ;;  %1067 = vmatmul.mubr.bf16.gmra.mrb[32].mxu1 %v3168_v11 }
 0x129   : > { %883 = vmatprep.mubr.bf16.mxu0 %v3469_v3  ;;  %1076 = vmatprep.mubr.bf16.mxu1 %v3469_v3 }
 0x130   : > { %884 = vmatmul.mubr.bf16.gmra.mrb[36].mxu0 %v3169_v12  ;;  %1077 = vmatmul.mubr.bf16.gmra.mrb[36].mxu1 %v3169_v12 }
 0x131   : > { %893 = vmatprep.mubr.bf16.mxu0 %v3469_v3  ;;  %1086 = vmatprep.mubr.bf16.mxu1 %v3469_v3 }
 0x138   : > { %894 = vmatmul.mubr.bf16.gmra.mrb[40].mxu0 %v3170_v13  ;;  %1087 = vmatmul.mubr.bf16.gmra.mrb[40].mxu1 %v3170_v13 }
 0x139   : > { %903 = vmatprep.mubr.bf16.mxu0 %v3469_v3  ;;  %1096 = vmatprep.mubr.bf16.mxu1 %v3469_v3 }
 0x140   : > { %904 = vmatmul.mubr.bf16.gmra.mrb[44].mxu0 %v3171_v14  ;;  %1097 = vmatmul.mubr.bf16.gmra.mrb[44].mxu1 %v3171_v14 }
 0x141   : > { %913 = vmatprep.mubr.bf16.mxu0 %v3469_v3  ;;  %1106 = vmatprep.mubr.bf16.mxu1 %v3469_v3 }
 0x148   : > { %914 = vmatmul.mubr.bf16.gmra.mrb[48].mxu0 %v3176_v15  ;;  %1107 = vmatmul.mubr.bf16.gmra.mrb[48].mxu1 %v3176_v15 }
 0x149   : > { %923 = vmatprep.mubr.bf16.mxu0 %v3469_v3  ;;  %1116 = vmatprep.mubr.bf16.mxu1 %v3469_v3 }
 0x150   : > { %924 = vmatmul.mubr.bf16.gmra.mrb[52].mxu0 %v3177_v16  ;;  %1117 = vmatmul.mubr.bf16.gmra.mrb[52].mxu1 %v3177_v16 }
 0x151   : > { %933 = vmatprep.mubr.bf16.mxu0 %v3469_v3  ;;  %1126 = vmatprep.mubr.bf16.mxu1 %v3469_v3 }
 0x158   : > { %934 = vmatmul.mubr.bf16.gmra.mrb[56].mxu0 %v3182_v17  ;;  %1127 = vmatmul.mubr.bf16.gmra.mrb[56].mxu1 %v3182_v17 }
 0x159   : > { %943 = vmatprep.mubr.bf16.mxu0 %v3469_v3  ;;  %1136 = vmatprep.mubr.bf16.mxu1 %v3469_v3 }
 0x160   : > { %944 = vmatmul.mubr.bf16.gmra.mrb[60].mxu0 %v3183_v18  ;;  %1137 = vmatmul.mubr.bf16.gmra.mrb[60].mxu1 %v3183_v18 }
 0x1bb   : > { %v795_v3 = vpop.f32.mrb[0].mxu0  ;;  %v988_v32 = vpop.f32.mrb[0].mxu1 }
 0x1bc   : > { %v796_v34 = vadd.f32 %v795_v3, %v3986_v26  ;;  %v989_v35 = vadd.f32 %v988_v32, %v3989_v28  ;;  %v797_v36 = vpop.f32.mrb[1].mxu0  ;;  %v990_v37 = vpop.f32.mrb[1].mxu1 }
 0x1bd   : > { %v798_v38 = vadd.f32 %v797_v36, %v3991_v29  ;;  %v991_v40 = vadd.f32 %v990_v37, %v3993_v30  ;;  %v799_v42 = vpop.f32.mrb[2].mxu0  ;;  %v992_v43 = vpop.f32.mrb[2].mxu1 }
 0x1be   : > { %v801_v44 = vpop.f32.mrb[3].mxu0  ;;  %v994_v45 = vpop.f32.mrb[3].mxu1  ;;  %vm1170_vm0 = vcmp.gt.f32.partialorder %v796_v34, %v3995_v31  ;;  %v1298_v46 = vmax.f32 %v796_v34, 0.0  ;;  %vm1172_vm1 = vcmp.gt.f32.partialorder %v989_v35, %v3997_v33  ;;  %v1300_v47 = vmax.f32 %v989_v35, 0.0 }
 0x1bf   : > { %v800_v48 = vadd.f32 %v799_v42, %v3986_v26  ;;  %v993_v49 = vadd.f32 %v992_v43, %v3989_v28  ;;  %v802_v50 = vadd.f32 %v801_v44, %v3991_v29  ;;  %v995_v51 = vadd.f32 %v994_v45, %v3993_v30 }
 0x1c0   : > { %vm1171_vm2 = vcmp.gt.f32.partialorder %v798_v38, %v4002_v39  ;;  %v1299_v52 = vmax.f32 %v798_v38, 0.0  ;;  %vm1173_vm3 = vcmp.gt.f32.partialorder %v991_v40, %v4005_v41  ;;  %v1301_v53 = vmax.f32 %v991_v40, 0.0 }
 0x1c1   : > { %vm1174_vm4 = vcmp.gt.f32.partialorder %v800_v48, %v3995_v31  ;;  %v1302_v54 = vmax.f32 %v800_v48, 0.0  ;;  %vm1176_vm5 = vcmp.gt.f32.partialorder %v993_v49, %v3997_v33  ;;  %v1304_v55 = vmax.f32 %v993_v49, 0.0 }
 0x1c2   : > { %vm4019_vm6 = vmpackc.low %vm1174_vm4, %vm1170_vm0  ;;  %vm1175_vm7 = vcmp.gt.f32.partialorder %v802_v50, %v4002_v39  ;;  %v1303_v57 = vmax.f32 %v802_v50, 0.0  ;;  %vm1177_vm8 = vcmp.gt.f32.partialorder %v995_v51, %v4005_v41  ;;  %v1305_v58 = vmax.f32 %v995_v51, 0.0 }
 0x1c3   : > { %v805_v59 = vpop.f32.mrb[4].mxu0  ;;  %v998_v60 = vpop.f32.mrb[4].mxu1  ;;  %v2565_v61 = vpack.c.bf16 %v1302_v54, %v1298_v46  ;;  %vm4027_vm9 = vmpackc.low %vm1176_vm5, %vm1172_vm1  ;;  %v2661_v63 = vpack.c.bf16 %v1304_v55, %v1300_v47 }
 0x1c4   : > { %v806_v0 = vadd.f32 %v805_v59, %v3986_v26  ;;  %v999_v1 = vadd.f32 %v998_v60, %v3989_v28  ;;  %v807_v2 = vpop.f32.mrb[5].mxu0  ;;  %v1000_v4 = vpop.f32.mrb[5].mxu1  ;;  %v2562_v5 = vpack.c.bf16 %v1303_v57, %v1299_v52  ;;  %v2658_v6 = vpack.c.bf16 %v1305_v58, %v1301_v53  ;;  %vm2561_vm10 = vmpackc.low %vm1175_vm7, %vm1171_vm2 }
 0x1c5   : > { %v808_v7 = vadd.f32 %v807_v2, %v3991_v29  ;;  %v1001_v8 = vadd.f32 %v1000_v4, %v3993_v30  ;;  %v809_v9 = vpop.f32.mrb[6].mxu0  ;;  %v1002_v10 = vpop.f32.mrb[6].mxu1  ;;  %vm2657_vm11 = vmpackc.low %vm1177_vm8, %vm1173_vm3 }
 0x1c6   : > { %v811_v11 = vpop.f32.mrb[7].mxu0  ;;  %v1004_v12 = vpop.f32.mrb[7].mxu1  ;;  %vm1178_vm12 = vcmp.gt.f32.partialorder %v806_v0, %v3995_v31  ;;  %v1306_v13 = vmax.f32 %v806_v0, 0.0  ;;  %vm1180_vm13 = vcmp.gt.f32.partialorder %v999_v1, %v3997_v33  ;;  %v1308_v14 = vmax.f32 %v999_v1, 0.0  ;;  %2563 = vmatprep.mubr.msk.bf16.mxu0 %vm2561_vm10, %v2562_v5  ;;  %2659 = vmatprep.mubr.msk.bf16.mxu1 %vm2657_vm11, %v2658_v6 }
 0x1c7   : > { %v810_v15 = vadd.f32 %v809_v9, %v3986_v26  ;;  %v1003_v16 = vadd.f32 %v1002_v10, %v3989_v28  ;;  %v812_v17 = vadd.f32 %v811_v11, %v3991_v29  ;;  %v1005_v18 = vadd.f32 %v1004_v12, %v3993_v30  ;;  %2566 = vmatmul.mubr.msk.bf16.vlgmr.msra.gmra.mrb[64].mxu0 %vm4019_vm6, %v2565_v61 }
 0x1c8   : > { %vm1179_vm14 = vcmp.gt.f32.partialorder %v808_v7, %v4002_v39  ;;  %v1307_v19 = vmax.f32 %v808_v7, 0.0  ;;  %vm1181_vm15 = vcmp.gt.f32.partialorder %v1001_v8, %v4005_v41  ;;  %v1309_v20 = vmax.f32 %v1001_v8, 0.0  ;;  %2662 = vmatmul.mubr.msk.bf16.vlgmr.msra.gmra.mrb[64].mxu1 %vm4027_vm9, %v2661_v63 }
 0x1c9   : > { %vm1182_vm0 = vcmp.gt.f32.partialorder %v810_v15, %v3995_v31  ;;  %v1310_v21 = vmax.f32 %v810_v15, 0.0  ;;  %vm1184_vm1 = vcmp.gt.f32.partialorder %v1003_v16, %v3997_v33  ;;  %v1312_v22 = vmax.f32 %v1003_v16, 0.0 }
 0x1ca   : > { %vm1183_vm2 = vcmp.gt.f32.partialorder %v812_v17, %v4002_v39  ;;  %v1311_v23 = vmax.f32 %v812_v17, 0.0  ;;  %vm1185_vm3 = vcmp.gt.f32.partialorder %v1005_v18, %v4005_v41  ;;  %v1313_v24 = vmax.f32 %v1005_v18, 0.0  ;;  %vm4061_vm4 = vmpackc.low %vm1182_vm0, %vm1178_vm12 }
 0x1cb   : > { %v815_v25 = vpop.f32.mrb[8].mxu0  ;;  %v1008_v27 = vpop.f32.mrb[8].mxu1  ;;  %v2571_v32 = vpack.c.bf16 %v1310_v21, %v1306_v13  ;;  %v2667_v34 = vpack.c.bf16 %v1312_v22, %v1308_v14  ;;  %vm2567_vm5 = vmpackc.low %vm1183_vm2, %vm1179_vm14 }
 0x1cc   : > { %v816_v35 = vadd.f32 %v815_v25, %v3986_v26  ;;  %v1009_v36 = vadd.f32 %v1008_v27, %v3989_v28  ;;  %v817_v37 = vpop.f32.mrb[9].mxu0  ;;  %v1010_v38 = vpop.f32.mrb[9].mxu1  ;;  %v2568_v40 = vpack.c.bf16 %v1311_v23, %v1307_v19  ;;  %v2664_v42 = vpack.c.bf16 %v1313_v24, %v1309_v20  ;;  %vm2663_vm6 = vmpackc.low %vm1185_vm3, %vm1181_vm15 }
 0x1cd   : > { %v818_v43 = vadd.f32 %v817_v37, %v3991_v29  ;;  %v1011_v44 = vadd.f32 %v1010_v38, %v3993_v30  ;;  %v819_v45 = vpop.f32.mrb[10].mxu0  ;;  %v1012_v46 = vpop.f32.mrb[10].mxu1  ;;  %vm4079_vm7 = vmpackc.low %vm1184_vm1, %vm1180_vm13 }
 0x1ce   : > { %v821_v47 = vpop.f32.mrb[11].mxu0  ;;  %v1014_v48 = vpop.f32.mrb[11].mxu1  ;;  %vm1186_vm8 = vcmp.gt.f32.partialorder %v816_v35, %v3995_v31  ;;  %v1314_v50 = vmax.f32 %v816_v35, 0.0  ;;  %vm1188_vm9 = vcmp.gt.f32.partialorder %v1009_v36, %v3997_v33  ;;  %v1316_v51 = vmax.f32 %v1009_v36, 0.0  ;;  %2569 = vmatprep.mubr.msk.bf16.mxu0 %vm2567_vm5, %v2568_v40  ;;  %2665 = vmatprep.mubr.msk.bf16.mxu1 %vm2663_vm6, %v2664_v42 }
 0x1cf   : > { %v820_v52 = vadd.f32 %v819_v45, %v3986_v26  ;;  %v1013_v53 = vadd.f32 %v1012_v46, %v3989_v28  ;;  %v822_v54 = vadd.f32 %v821_v47, %v3991_v29  ;;  %v1015_v55 = vadd.f32 %v1014_v48, %v3993_v30  ;;  %2572 = vmatmul.mubr.msk.bf16.gmra.mrb[68].mxu0 %vm4061_vm4, %v2571_v32 }
 0x1d0   : > { %vm1187_vm10 = vcmp.gt.f32.partialorder %v818_v43, %v4002_v39  ;;  %v1315_v56 = vmax.f32 %v818_v43, 0.0  ;;  %vm1189_vm11 = vcmp.gt.f32.partialorder %v1011_v44, %v4005_v41  ;;  %v1317_v57 = vmax.f32 %v1011_v44, 0.0  ;;  %2668 = vmatmul.mubr.msk.bf16.gmra.mrb[68].mxu1 %vm4079_vm7, %v2667_v34 }
 0x1d1   : > { %vm1190_vm12 = vcmp.gt.f32.partialorder %v820_v52, %v3995_v31  ;;  %v1318_v58 = vmax.f32 %v820_v52, 0.0  ;;  %vm1192_vm13 = vcmp.gt.f32.partialorder %v1013_v53, %v3997_v33  ;;  %v1320_v59 = vmax.f32 %v1013_v53, 0.0 }
 0x1d2   : > { %vm1191_vm14 = vcmp.gt.f32.partialorder %v822_v54, %v4002_v39  ;;  %v1319_v60 = vmax.f32 %v822_v54, 0.0  ;;  %vm1193_vm15 = vcmp.gt.f32.partialorder %v1015_v55, %v4005_v41  ;;  %v1321_v61 = vmax.f32 %v1015_v55, 0.0  ;;  %vm4101_vm0 = vmpackc.low %vm1190_vm12, %vm1186_vm8 }
 0x1d3   : > { %v825_v62 = vpop.f32.mrb[12].mxu0  ;;  %v1018_v63 = vpop.f32.mrb[12].mxu1  ;;  %v2577_v1 = vpack.c.bf16 %v1318_v58, %v1314_v50  ;;  %v2673_v2 = vpack.c.bf16 %v1320_v59, %v1316_v51  ;;  %vm2573_vm1 = vmpackc.low %vm1191_vm14, %vm1187_vm10 }
 0x1d4   : > { %v826_v4 = vadd.f32 %v825_v62, %v3986_v26  ;;  %v1019_v5 = vadd.f32 %v1018_v63, %v3989_v28  ;;  %v827_v6 = vpop.f32.mrb[13].mxu0  ;;  %v1020_v7 = vpop.f32.mrb[13].mxu1  ;;  %v2574_v8 = vpack.c.bf16 %v1319_v60, %v1315_v56  ;;  %v2670_v9 = vpack.c.bf16 %v1321_v61, %v1317_v57  ;;  %vm2669_vm2 = vmpackc.low %vm1193_vm15, %vm1189_vm11 }
 0x1d5   : > { %v828_v10 = vadd.f32 %v827_v6, %v3991_v29  ;;  %v1021_v11 = vadd.f32 %v1020_v7, %v3993_v30  ;;  %v829_v12 = vpop.f32.mrb[14].mxu0  ;;  %v1022_v13 = vpop.f32.mrb[14].mxu1  ;;  %vm4119_vm3 = vmpackc.low %vm1192_vm13, %vm1188_vm9 }
 0x1d6   : > { %v831_v14 = vpop.f32.mrb[15].mxu0  ;;  %v1024_v15 = vpop.f32.mrb[15].mxu1  ;;  %vm1194_vm4 = vcmp.gt.f32.partialorder %v826_v4, %v3995_v31  ;;  %v1322_v17 = vmax.f32 %v826_v4, 0.0  ;;  %vm1196_vm5 = vcmp.gt.f32.partialorder %v1019_v5, %v3997_v33  ;;  %v1324_v18 = vmax.f32 %v1019_v5, 0.0  ;;  %2575 = vmatprep.mubr.msk.bf16.mxu0 %vm2573_vm1, %v2574_v8  ;;  %2671 = vmatprep.mubr.msk.bf16.mxu1 %vm2669_vm2, %v2670_v9 }
 0x1d7   : > { %v830_v19 = vadd.f32 %v829_v12, %v3986_v26  ;;  %v1023_v20 = vadd.f32 %v1022_v13, %v3989_v28  ;;  %v832_v21 = vadd.f32 %v831_v14, %v3991_v29  ;;  %v1025_v22 = vadd.f32 %v1024_v15, %v3993_v30  ;;  %2578 = vmatmul.mubr.msk.bf16.gmra.mrb[72].mxu0 %vm4101_vm0, %v2577_v1 }
 0x1d8   : > { %vm1195_vm6 = vcmp.gt.f32.partialorder %v828_v10, %v4002_v39  ;;  %v1323_v23 = vmax.f32 %v828_v10, 0.0  ;;  %vm1197_vm7 = vcmp.gt.f32.partialorder %v1021_v11, %v4005_v41  ;;  %v1325_v24 = vmax.f32 %v1021_v11, 0.0  ;;  %2674 = vmatmul.mubr.msk.bf16.gmra.mrb[72].mxu1 %vm4119_vm3, %v2673_v2 }
 0x1d9   : > { %vm1198_vm8 = vcmp.gt.f32.partialorder %v830_v19, %v3995_v31  ;;  %v1326_v25 = vmax.f32 %v830_v19, 0.0  ;;  %vm1200_vm9 = vcmp.gt.f32.partialorder %v1023_v20, %v3997_v33  ;;  %v1328_v27 = vmax.f32 %v1023_v20, 0.0 }
 0x1da   : > { %vm1199_vm10 = vcmp.gt.f32.partialorder %v832_v21, %v4002_v39  ;;  %v1327_v3 = vmax.f32 %v832_v21, 0.0  ;;  %vm1201_vm11 = vcmp.gt.f32.partialorder %v1025_v22, %v4005_v41  ;;  %v1329_v32 = vmax.f32 %v1025_v22, 0.0  ;;  %vm4141_vm12 = vmpackc.low %vm1198_vm8, %vm1194_vm4 }
 0x1db   : > { %v835_v34 = vpop.f32.mrb[16].mxu0  ;;  %v1028_v35 = vpop.f32.mrb[16].mxu1  ;;  %v2583_v37 = vpack.c.bf16 %v1326_v25, %v1322_v17  ;;  %v2679_v38 = vpack.c.bf16 %v1328_v27, %v1324_v18  ;;  %vm2579_vm13 = vmpackc.low %vm1199_vm10, %vm1195_vm6 }
 0x1dc   : > { %v836_v40 = vadd.f32 %v835_v34, %v3986_v26  ;;  %v1029_v42 = vadd.f32 %v1028_v35, %v3989_v28  ;;  %v837_v43 = vpop.f32.mrb[17].mxu0  ;;  %v1030_v44 = vpop.f32.mrb[17].mxu1  ;;  %v2580_v45 = vpack.c.bf16 %v1327_v3, %v1323_v23  ;;  %v2676_v46 = vpack.c.bf16 %v1329_v32, %v1325_v24  ;;  %vm2675_vm14 = vmpackc.low %vm1201_vm11, %vm1197_vm7 }
 0x1dd   : > { %v838_v47 = vadd.f32 %v837_v43, %v3991_v29  ;;  %v1031_v48 = vadd.f32 %v1030_v44, %v3993_v30  ;;  %v839_v49 = vpop.f32.mrb[18].mxu0  ;;  %v1032_v50 = vpop.f32.mrb[18].mxu1  ;;  %vm4159_vm15 = vmpackc.low %vm1200_vm9, %vm1196_vm5 }
 0x1de   : > { %v841_v51 = vpop.f32.mrb[19].mxu0  ;;  %v1034_v52 = vpop.f32.mrb[19].mxu1  ;;  %vm1202_vm0 = vcmp.gt.f32.partialorder %v836_v40, %v3995_v31  ;;  %v1330_v54 = vmax.f32 %v836_v40, 0.0  ;;  %vm1204_vm1 = vcmp.gt.f32.partialorder %v1029_v42, %v3997_v33  ;;  %v1332_v55 = vmax.f32 %v1029_v42, 0.0  ;;  %2581 = vmatprep.mubr.msk.bf16.mxu0 %vm2579_vm13, %v2580_v45  ;;  %2677 = vmatprep.mubr.msk.bf16.mxu1 %vm2675_vm14, %v2676_v46 }
 0x1df   : > { %v840_v56 = vadd.f32 %v839_v49, %v3986_v26  ;;  %v1033_v57 = vadd.f32 %v1032_v50, %v3989_v28  ;;  %v842_v58 = vadd.f32 %v841_v51, %v3991_v29  ;;  %v1035_v59 = vadd.f32 %v1034_v52, %v3993_v30  ;;  %2584 = vmatmul.mubr.msk.bf16.gmra.mrb[76].mxu0 %vm4141_vm12, %v2583_v37 }
 0x1e0   : > { %vm1203_vm2 = vcmp.gt.f32.partialorder %v838_v47, %v4002_v39  ;;  %v1331_v60 = vmax.f32 %v838_v47, 0.0  ;;  %vm1205_vm3 = vcmp.gt.f32.partialorder %v1031_v48, %v4005_v41  ;;  %v1333_v61 = vmax.f32 %v1031_v48, 0.0  ;;  %2680 = vmatmul.mubr.msk.bf16.gmra.mrb[76].mxu1 %vm4159_vm15, %v2679_v38 }
 0x1e1   : > { %vm1206_vm4 = vcmp.gt.f32.partialorder %v840_v56, %v3995_v31  ;;  %v1334_v62 = vmax.f32 %v840_v56, 0.0  ;;  %vm1208_vm5 = vcmp.gt.f32.partialorder %v1033_v57, %v3997_v33  ;;  %v1336_v63 = vmax.f32 %v1033_v57, 0.0 }
 0x1e2   : > { %vm1207_vm6 = vcmp.gt.f32.partialorder %v842_v58, %v4002_v39  ;;  %v1335_v0 = vmax.f32 %v842_v58, 0.0  ;;  %vm1209_vm7 = vcmp.gt.f32.partialorder %v1035_v59, %v4005_v41  ;;  %v1337_v1 = vmax.f32 %v1035_v59, 0.0  ;;  %vm4181_vm8 = vmpackc.low %vm1206_vm4, %vm1202_vm0 }
 0x1e3   : > { %v845_v2 = vpop.f32.mrb[20].mxu0  ;;  %v1038_v4 = vpop.f32.mrb[20].mxu1  ;;  %v2589_v6 = vpack.c.bf16 %v1334_v62, %v1330_v54  ;;  %v2685_v7 = vpack.c.bf16 %v1336_v63, %v1332_v55  ;;  %vm2585_vm9 = vmpackc.low %vm1207_vm6, %vm1203_vm2 }
 0x1e4   : > { %v846_v8 = vadd.f32 %v845_v2, %v3986_v26  ;;  %v1039_v9 = vadd.f32 %v1038_v4, %v3989_v28  ;;  %v847_v10 = vpop.f32.mrb[21].mxu0  ;;  %v1040_v11 = vpop.f32.mrb[21].mxu1  ;;  %v2586_v12 = vpack.c.bf16 %v1335_v0, %v1331_v60  ;;  %v2682_v13 = vpack.c.bf16 %v1337_v1, %v1333_v61  ;;  %vm2681_vm10 = vmpackc.low %vm1209_vm7, %vm1205_vm3 }
 0x1e5   : > { %v848_v14 = vadd.f32 %v847_v10, %v3991_v29  ;;  %v1041_v15 = vadd.f32 %v1040_v11, %v3993_v30  ;;  %v849_v16 = vpop.f32.mrb[22].mxu0  ;;  %v1042_v17 = vpop.f32.mrb[22].mxu1  ;;  %vm4199_vm11 = vmpackc.low %vm1208_vm5, %vm1204_vm1 }
 0x1e6   : > { %v851_v18 = vpop.f32.mrb[23].mxu0  ;;  %v1044_v19 = vpop.f32.mrb[23].mxu1  ;;  %vm1210_vm12 = vcmp.gt.f32.partialorder %v846_v8, %v3995_v31  ;;  %v1338_v21 = vmax.f32 %v846_v8, 0.0  ;;  %vm1212_vm13 = vcmp.gt.f32.partialorder %v1039_v9, %v3997_v33  ;;  %v1340_v22 = vmax.f32 %v1039_v9, 0.0  ;;  %2587 = vmatprep.mubr.msk.bf16.mxu0 %vm2585_vm9, %v2586_v12  ;;  %2683 = vmatprep.mubr.msk.bf16.mxu1 %vm2681_vm10, %v2682_v13 }
 0x1e7   : > { %v850_v23 = vadd.f32 %v849_v16, %v3986_v26  ;;  %v1043_v24 = vadd.f32 %v1042_v17, %v3989_v28  ;;  %v852_v25 = vadd.f32 %v851_v18, %v3991_v29  ;;  %v1045_v27 = vadd.f32 %v1044_v19, %v3993_v30  ;;  %2590 = vmatmul.mubr.msk.bf16.gmra.mrb[80].mxu0 %vm4181_vm8, %v2589_v6 }
 0x1e8   : > { %vm1211_vm14 = vcmp.gt.f32.partialorder %v848_v14, %v4002_v39  ;;  %v1339_v3 = vmax.f32 %v848_v14, 0.0  ;;  %vm1213_vm15 = vcmp.gt.f32.partialorder %v1041_v15, %v4005_v41  ;;  %v1341_v32 = vmax.f32 %v1041_v15, 0.0  ;;  %2686 = vmatmul.mubr.msk.bf16.gmra.mrb[80].mxu1 %vm4199_vm11, %v2685_v7 }
 0x1e9   : > { %vm1214_vm0 = vcmp.gt.f32.partialorder %v850_v23, %v3995_v31  ;;  %v1342_v34 = vmax.f32 %v850_v23, 0.0  ;;  %vm1216_vm1 = vcmp.gt.f32.partialorder %v1043_v24, %v3997_v33  ;;  %v1344_v35 = vmax.f32 %v1043_v24, 0.0 }
 0x1ea   : > { %vm1215_vm2 = vcmp.gt.f32.partialorder %v852_v25, %v4002_v39  ;;  %v1343_v36 = vmax.f32 %v852_v25, 0.0  ;;  %vm1217_vm3 = vcmp.gt.f32.partialorder %v1045_v27, %v4005_v41  ;;  %v1345_v37 = vmax.f32 %v1045_v27, 0.0  ;;  %vm4221_vm4 = vmpackc.low %vm1214_vm0, %vm1210_vm12 }
 0x1eb   : > { %v855_v38 = vpop.f32.mrb[24].mxu0  ;;  %v1048_v40 = vpop.f32.mrb[24].mxu1  ;;  %v2595_v43 = vpack.c.bf16 %v1342_v34, %v1338_v21  ;;  %v2691_v44 = vpack.c.bf16 %v1344_v35, %v1340_v22  ;;  %vm2591_vm5 = vmpackc.low %vm1215_vm2, %vm1211_vm14 }
 0x1ec   : > { %v856_v45 = vadd.f32 %v855_v38, %v3986_v26  ;;  %v1049_v46 = vadd.f32 %v1048_v40, %v3989_v28  ;;  %v857_v47 = vpop.f32.mrb[25].mxu0  ;;  %v1050_v48 = vpop.f32.mrb[25].mxu1  ;;  %v2592_v49 = vpack.c.bf16 %v1343_v36, %v1339_v3  ;;  %v2688_v50 = vpack.c.bf16 %v1345_v37, %v1341_v32  ;;  %vm2687_vm6 = vmpackc.low %vm1217_vm3, %vm1213_vm15 }
 0x1ed   : > { %v858_v51 = vadd.f32 %v857_v47, %v3991_v29  ;;  %v1051_v52 = vadd.f32 %v1050_v48, %v3993_v30  ;;  %v859_v53 = vpop.f32.mrb[26].mxu0  ;;  %v1052_v54 = vpop.f32.mrb[26].mxu1  ;;  %vm4239_vm7 = vmpackc.low %vm1216_vm1, %vm1212_vm13 }
 0x1ee   : > { %v861_v55 = vpop.f32.mrb[27].mxu0  ;;  %v1054_v56 = vpop.f32.mrb[27].mxu1  ;;  %vm1218_vm8 = vcmp.gt.f32.partialorder %v856_v45, %v3995_v31  ;;  %v1346_v58 = vmax.f32 %v856_v45, 0.0  ;;  %vm1220_vm9 = vcmp.gt.f32.partialorder %v1049_v46, %v3997_v33  ;;  %v1348_v59 = vmax.f32 %v1049_v46, 0.0  ;;  %2593 = vmatprep.mubr.msk.bf16.mxu0 %vm2591_vm5, %v2592_v49  ;;  %2689 = vmatprep.mubr.msk.bf16.mxu1 %vm2687_vm6, %v2688_v50 }
 0x1ef   : > { %v860_v60 = vadd.f32 %v859_v53, %v3986_v26  ;;  %v1053_v61 = vadd.f32 %v1052_v54, %v3989_v28  ;;  %v862_v62 = vadd.f32 %v861_v55, %v3991_v29  ;;  %v1055_v63 = vadd.f32 %v1054_v56, %v3993_v30  ;;  %2596 = vmatmul.mubr.msk.bf16.gmra.mrb[84].mxu0 %vm4221_vm4, %v2595_v43 }
 0x1f0   : > { %vm1219_vm10 = vcmp.gt.f32.partialorder %v858_v51, %v4002_v39  ;;  %v1347_v0 = vmax.f32 %v858_v51, 0.0  ;;  %vm1221_vm11 = vcmp.gt.f32.partialorder %v1051_v52, %v4005_v41  ;;  %v1349_v1 = vmax.f32 %v1051_v52, 0.0  ;;  %2692 = vmatmul.mubr.msk.bf16.gmra.mrb[84].mxu1 %vm4239_vm7, %v2691_v44 }
 0x1f1   : > { %vm1222_vm12 = vcmp.gt.f32.partialorder %v860_v60, %v3995_v31  ;;  %v1350_v2 = vmax.f32 %v860_v60, 0.0  ;;  %vm1224_vm13 = vcmp.gt.f32.partialorder %v1053_v61, %v3997_v33  ;;  %v1352_v4 = vmax.f32 %v1053_v61, 0.0 }
 0x1f2   : > { %vm1223_vm14 = vcmp.gt.f32.partialorder %v862_v62, %v4002_v39  ;;  %v1351_v5 = vmax.f32 %v862_v62, 0.0  ;;  %vm1225_vm15 = vcmp.gt.f32.partialorder %v1055_v63, %v4005_v41  ;;  %v1353_v6 = vmax.f32 %v1055_v63, 0.0  ;;  %vm4261_vm0 = vmpackc.low %vm1222_vm12, %vm1218_vm8 }
 0x1f3   : > { %v865_v7 = vpop.f32.mrb[28].mxu0  ;;  %v1058_v8 = vpop.f32.mrb[28].mxu1  ;;  %v2601_v10 = vpack.c.bf16 %v1350_v2, %v1346_v58  ;;  %v2697_v11 = vpack.c.bf16 %v1352_v4, %v1348_v59  ;;  %vm2597_vm1 = vmpackc.low %vm1223_vm14, %vm1219_vm10 }
 0x1f4   : > { %v866_v12 = vadd.f32 %v865_v7, %v3986_v26  ;;  %v1059_v13 = vadd.f32 %v1058_v8, %v3989_v28  ;;  %v867_v14 = vpop.f32.mrb[29].mxu0  ;;  %v1060_v15 = vpop.f32.mrb[29].mxu1  ;;  %v2598_v16 = vpack.c.bf16 %v1351_v5, %v1347_v0  ;;  %v2694_v17 = vpack.c.bf16 %v1353_v6, %v1349_v1  ;;  %vm2693_vm2 = vmpackc.low %vm1225_vm15, %vm1221_vm11 }
 0x1f5   : > { %v868_v18 = vadd.f32 %v867_v14, %v3991_v29  ;;  %v1061_v19 = vadd.f32 %v1060_v15, %v3993_v30  ;;  %v869_v20 = vpop.f32.mrb[30].mxu0  ;;  %v1062_v21 = vpop.f32.mrb[30].mxu1  ;;  %vm4279_vm3 = vmpackc.low %vm1224_vm13, %vm1220_vm9 }
 0x1f6   : > { %v871_v22 = vpop.f32.mrb[31].mxu0  ;;  %v1064_v23 = vpop.f32.mrb[31].mxu1  ;;  %vm1226_vm4 = vcmp.gt.f32.partialorder %v866_v12, %v3995_v31  ;;  %v1354_v25 = vmax.f32 %v866_v12, 0.0  ;;  %vm1228_vm5 = vcmp.gt.f32.partialorder %v1059_v13, %v3997_v33  ;;  %v1356_v27 = vmax.f32 %v1059_v13, 0.0  ;;  %2599 = vmatprep.mubr.msk.bf16.mxu0 %vm2597_vm1, %v2598_v16  ;;  %2695 = vmatprep.mubr.msk.bf16.mxu1 %vm2693_vm2, %v2694_v17 }
 0x1f7   : > { %v870_v3 = vadd.f32 %v869_v20, %v3986_v26  ;;  %v1063_v32 = vadd.f32 %v1062_v21, %v3989_v28  ;;  %v872_v34 = vadd.f32 %v871_v22, %v3991_v29  ;;  %v1065_v35 = vadd.f32 %v1064_v23, %v3993_v30  ;;  %2602 = vmatmul.mubr.msk.bf16.gmra.mrb[88].mxu0 %vm4261_vm0, %v2601_v10 }
 0x1f8   : > { %vm1227_vm6 = vcmp.gt.f32.partialorder %v868_v18, %v4002_v39  ;;  %v1355_v36 = vmax.f32 %v868_v18, 0.0  ;;  %vm1229_vm7 = vcmp.gt.f32.partialorder %v1061_v19, %v4005_v41  ;;  %v1357_v37 = vmax.f32 %v1061_v19, 0.0  ;;  %2698 = vmatmul.mubr.msk.bf16.gmra.mrb[88].mxu1 %vm4279_vm3, %v2697_v11 }
 0x1f9   : > { %vm1230_vm8 = vcmp.gt.f32.partialorder %v870_v3, %v3995_v31  ;;  %v1358_v38 = vmax.f32 %v870_v3, 0.0  ;;  %vm1232_vm9 = vcmp.gt.f32.partialorder %v1063_v32, %v3997_v33  ;;  %v1360_v40 = vmax.f32 %v1063_v32, 0.0 }
 0x1fa   : > { %vm1231_vm10 = vcmp.gt.f32.partialorder %v872_v34, %v4002_v39  ;;  %v1359_v42 = vmax.f32 %v872_v34, 0.0  ;;  %vm1233_vm11 = vcmp.gt.f32.partialorder %v1065_v35, %v4005_v41  ;;  %v1361_v43 = vmax.f32 %v1065_v35, 0.0  ;;  %vm4301_vm12 = vmpackc.low %vm1230_vm8, %vm1226_vm4 }
 0x1fb   : > { %v875_v44 = vpop.f32.mrb[32].mxu0  ;;  %v1068_v45 = vpop.f32.mrb[32].mxu1  ;;  %v2607_v47 = vpack.c.bf16 %v1358_v38, %v1354_v25  ;;  %v2703_v48 = vpack.c.bf16 %v1360_v40, %v1356_v27  ;;  %vm2603_vm13 = vmpackc.low %vm1231_vm10, %vm1227_vm6 }
 0x1fc   : > { %v876_v49 = vadd.f32 %v875_v44, %v3986_v26  ;;  %v1069_v50 = vadd.f32 %v1068_v45, %v3989_v28  ;;  %v877_v51 = vpop.f32.mrb[33].mxu0  ;;  %v1070_v52 = vpop.f32.mrb[33].mxu1  ;;  %v2604_v53 = vpack.c.bf16 %v1359_v42, %v1355_v36  ;;  %v2700_v54 = vpack.c.bf16 %v1361_v43, %v1357_v37  ;;  %vm2699_vm14 = vmpackc.low %vm1233_vm11, %vm1229_vm7 }
 0x1fd   : > { %v878_v55 = vadd.f32 %v877_v51, %v3991_v29  ;;  %v1071_v56 = vadd.f32 %v1070_v52, %v3993_v30  ;;  %v879_v57 = vpop.f32.mrb[34].mxu0  ;;  %v1072_v58 = vpop.f32.mrb[34].mxu1  ;;  %vm4319_vm15 = vmpackc.low %vm1232_vm9, %vm1228_vm5 }
 0x1fe   : > { %v881_v59 = vpop.f32.mrb[35].mxu0  ;;  %v1074_v60 = vpop.f32.mrb[35].mxu1  ;;  %vm1234_vm0 = vcmp.gt.f32.partialorder %v876_v49, %v3995_v31  ;;  %v1362_v62 = vmax.f32 %v876_v49, 0.0  ;;  %vm1236_vm1 = vcmp.gt.f32.partialorder %v1069_v50, %v3997_v33  ;;  %v1364_v63 = vmax.f32 %v1069_v50, 0.0  ;;  %2605 = vmatprep.mubr.msk.bf16.mxu0 %vm2603_vm13, %v2604_v53  ;;  %2701 = vmatprep.mubr.msk.bf16.mxu1 %vm2699_vm14, %v2700_v54 }
 0x1ff   : > { %v880_v0 = vadd.f32 %v879_v57, %v3986_v26  ;;  %v1073_v1 = vadd.f32 %v1072_v58, %v3989_v28  ;;  %v882_v2 = vadd.f32 %v881_v59, %v3991_v29  ;;  %v1075_v4 = vadd.f32 %v1074_v60, %v3993_v30  ;;  %2608 = vmatmul.mubr.msk.bf16.gmra.mrb[92].mxu0 %vm4301_vm12, %v2607_v47 }
 0x200   : > { %vm1235_vm2 = vcmp.gt.f32.partialorder %v878_v55, %v4002_v39  ;;  %v1363_v5 = vmax.f32 %v878_v55, 0.0  ;;  %vm1237_vm3 = vcmp.gt.f32.partialorder %v1071_v56, %v4005_v41  ;;  %v1365_v6 = vmax.f32 %v1071_v56, 0.0  ;;  %2704 = vmatmul.mubr.msk.bf16.gmra.mrb[92].mxu1 %vm4319_vm15, %v2703_v48 }
 0x201   : > { %vm1238_vm4 = vcmp.gt.f32.partialorder %v880_v0, %v3995_v31  ;;  %v1366_v7 = vmax.f32 %v880_v0, 0.0  ;;  %vm1240_vm5 = vcmp.gt.f32.partialorder %v1073_v1, %v3997_v33  ;;  %v1368_v8 = vmax.f32 %v1073_v1, 0.0 }
 0x202   : > { %vm1239_vm6 = vcmp.gt.f32.partialorder %v882_v2, %v4002_v39  ;;  %v1367_v9 = vmax.f32 %v882_v2, 0.0  ;;  %vm1241_vm7 = vcmp.gt.f32.partialorder %v1075_v4, %v4005_v41  ;;  %v1369_v10 = vmax.f32 %v1075_v4, 0.0  ;;  %vm4341_vm8 = vmpackc.low %vm1238_vm4, %vm1234_vm0 }
 0x203   : > { %v885_v11 = vpop.f32.mrb[36].mxu0  ;;  %v1078_v12 = vpop.f32.mrb[36].mxu1  ;;  %v2613_v14 = vpack.c.bf16 %v1366_v7, %v1362_v62  ;;  %v2709_v15 = vpack.c.bf16 %v1368_v8, %v1364_v63  ;;  %vm2609_vm9 = vmpackc.low %vm1239_vm6, %vm1235_vm2 }
 0x204   : > { %v886_v16 = vadd.f32 %v885_v11, %v3986_v26  ;;  %v1079_v17 = vadd.f32 %v1078_v12, %v3989_v28  ;;  %v887_v18 = vpop.f32.mrb[37].mxu0  ;;  %v1080_v19 = vpop.f32.mrb[37].mxu1  ;;  %v2610_v20 = vpack.c.bf16 %v1367_v9, %v1363_v5  ;;  %v2706_v21 = vpack.c.bf16 %v1369_v10, %v1365_v6  ;;  %vm2705_vm10 = vmpackc.low %vm1241_vm7, %vm1237_vm3 }
 0x205   : > { %v888_v22 = vadd.f32 %v887_v18, %v3991_v29  ;;  %v1081_v23 = vadd.f32 %v1080_v19, %v3993_v30  ;;  %v889_v24 = vpop.f32.mrb[38].mxu0  ;;  %v1082_v25 = vpop.f32.mrb[38].mxu1  ;;  %vm4359_vm11 = vmpackc.low %vm1240_vm5, %vm1236_vm1 }
 0x206   : > { %v891_v27 = vpop.f32.mrb[39].mxu0  ;;  %v1084_v3 = vpop.f32.mrb[39].mxu1  ;;  %vm1242_vm12 = vcmp.gt.f32.partialorder %v886_v16, %v3995_v31  ;;  %v1370_v34 = vmax.f32 %v886_v16, 0.0  ;;  %vm1244_vm13 = vcmp.gt.f32.partialorder %v1079_v17, %v3997_v33  ;;  %v1372_v35 = vmax.f32 %v1079_v17, 0.0  ;;  %2611 = vmatprep.mubr.msk.bf16.mxu0 %vm2609_vm9, %v2610_v20  ;;  %2707 = vmatprep.mubr.msk.bf16.mxu1 %vm2705_vm10, %v2706_v21 }
 0x207   : > { %v890_v36 = vadd.f32 %v889_v24, %v3986_v26  ;;  %v1083_v37 = vadd.f32 %v1082_v25, %v3989_v28  ;;  %v892_v38 = vadd.f32 %v891_v27, %v3991_v29  ;;  %v1085_v40 = vadd.f32 %v1084_v3, %v3993_v30  ;;  %2614 = vmatmul.mubr.msk.bf16.gmra.mrb[96].mxu0 %vm4341_vm8, %v2613_v14 }
 0x208   : > { %vm1243_vm14 = vcmp.gt.f32.partialorder %v888_v22, %v4002_v39  ;;  %v1371_v42 = vmax.f32 %v888_v22, 0.0  ;;  %vm1245_vm15 = vcmp.gt.f32.partialorder %v1081_v23, %v4005_v41  ;;  %v1373_v43 = vmax.f32 %v1081_v23, 0.0  ;;  %2710 = vmatmul.mubr.msk.bf16.gmra.mrb[96].mxu1 %vm4359_vm11, %v2709_v15 }
 0x209   : > { %vm1246_vm0 = vcmp.gt.f32.partialorder %v890_v36, %v3995_v31  ;;  %v1374_v44 = vmax.f32 %v890_v36, 0.0  ;;  %vm1248_vm1 = vcmp.gt.f32.partialorder %v1083_v37, %v3997_v33  ;;  %v1376_v45 = vmax.f32 %v1083_v37, 0.0 }
 0x20a   : > { %vm1247_vm2 = vcmp.gt.f32.partialorder %v892_v38, %v4002_v39  ;;  %v1375_v46 = vmax.f32 %v892_v38, 0.0  ;;  %vm1249_vm3 = vcmp.gt.f32.partialorder %v1085_v40, %v4005_v41  ;;  %v1377_v47 = vmax.f32 %v1085_v40, 0.0  ;;  %vm4381_vm4 = vmpackc.low %vm1246_vm0, %vm1242_vm12 }
 0x20b   : > { %v895_v48 = vpop.f32.mrb[40].mxu0  ;;  %v1088_v49 = vpop.f32.mrb[40].mxu1  ;;  %v2619_v51 = vpack.c.bf16 %v1374_v44, %v1370_v34  ;;  %v2715_v52 = vpack.c.bf16 %v1376_v45, %v1372_v35  ;;  %vm2615_vm5 = vmpackc.low %vm1247_vm2, %vm1243_vm14 }
 0x20c   : > { %v896_v53 = vadd.f32 %v895_v48, %v3986_v26  ;;  %v1089_v54 = vadd.f32 %v1088_v49, %v3989_v28  ;;  %v897_v55 = vpop.f32.mrb[41].mxu0  ;;  %v1090_v56 = vpop.f32.mrb[41].mxu1  ;;  %v2616_v57 = vpack.c.bf16 %v1375_v46, %v1371_v42  ;;  %v2712_v58 = vpack.c.bf16 %v1377_v47, %v1373_v43  ;;  %vm2711_vm6 = vmpackc.low %vm1249_vm3, %vm1245_vm15 }
 0x20d   : > { %v898_v59 = vadd.f32 %v897_v55, %v3991_v29  ;;  %v1091_v60 = vadd.f32 %v1090_v56, %v3993_v30  ;;  %v899_v61 = vpop.f32.mrb[42].mxu0  ;;  %v1092_v62 = vpop.f32.mrb[42].mxu1  ;;  %vm4399_vm7 = vmpackc.low %vm1248_vm1, %vm1244_vm13 }
 0x20e   : > { %v901_v63 = vpop.f32.mrb[43].mxu0  ;;  %v1094_v0 = vpop.f32.mrb[43].mxu1  ;;  %vm1250_vm8 = vcmp.gt.f32.partialorder %v896_v53, %v3995_v31  ;;  %v1378_v2 = vmax.f32 %v896_v53, 0.0  ;;  %vm1252_vm9 = vcmp.gt.f32.partialorder %v1089_v54, %v3997_v33  ;;  %v1380_v4 = vmax.f32 %v1089_v54, 0.0  ;;  %2617 = vmatprep.mubr.msk.bf16.mxu0 %vm2615_vm5, %v2616_v57  ;;  %2713 = vmatprep.mubr.msk.bf16.mxu1 %vm2711_vm6, %v2712_v58 }
 0x20f   : > { %v900_v5 = vadd.f32 %v899_v61, %v3986_v26  ;;  %v1093_v6 = vadd.f32 %v1092_v62, %v3989_v28  ;;  %v902_v7 = vadd.f32 %v901_v63, %v3991_v29  ;;  %v1095_v8 = vadd.f32 %v1094_v0, %v3993_v30  ;;  %2620 = vmatmul.mubr.msk.bf16.gmra.mrb[100].mxu0 %vm4381_vm4, %v2619_v51 }
 0x210   : > { %vm1251_vm10 = vcmp.gt.f32.partialorder %v898_v59, %v4002_v39  ;;  %v1379_v9 = vmax.f32 %v898_v59, 0.0  ;;  %vm1253_vm11 = vcmp.gt.f32.partialorder %v1091_v60, %v4005_v41  ;;  %v1381_v10 = vmax.f32 %v1091_v60, 0.0  ;;  %2716 = vmatmul.mubr.msk.bf16.gmra.mrb[100].mxu1 %vm4399_vm7, %v2715_v52 }
 0x211   : > { %vm1254_vm12 = vcmp.gt.f32.partialorder %v900_v5, %v3995_v31  ;;  %v1382_v11 = vmax.f32 %v900_v5, 0.0  ;;  %vm1256_vm13 = vcmp.gt.f32.partialorder %v1093_v6, %v3997_v33  ;;  %v1384_v12 = vmax.f32 %v1093_v6, 0.0 }
 0x212   : > { %vm1255_vm14 = vcmp.gt.f32.partialorder %v902_v7, %v4002_v39  ;;  %v1383_v13 = vmax.f32 %v902_v7, 0.0  ;;  %vm1257_vm15 = vcmp.gt.f32.partialorder %v1095_v8, %v4005_v41  ;;  %v1385_v14 = vmax.f32 %v1095_v8, 0.0  ;;  %vm4421_vm0 = vmpackc.low %vm1254_vm12, %vm1250_vm8 }
 0x213   : > { %v905_v15 = vpop.f32.mrb[44].mxu0  ;;  %v1098_v16 = vpop.f32.mrb[44].mxu1  ;;  %v2625_v18 = vpack.c.bf16 %v1382_v11, %v1378_v2  ;;  %v2721_v19 = vpack.c.bf16 %v1384_v12, %v1380_v4  ;;  %vm2621_vm1 = vmpackc.low %vm1255_vm14, %vm1251_vm10 }
 0x214   : > { %v906_v20 = vadd.f32 %v905_v15, %v3986_v26  ;;  %v1099_v21 = vadd.f32 %v1098_v16, %v3989_v28  ;;  %v907_v22 = vpop.f32.mrb[45].mxu0  ;;  %v1100_v23 = vpop.f32.mrb[45].mxu1  ;;  %v2622_v24 = vpack.c.bf16 %v1383_v13, %v1379_v9  ;;  %v2718_v25 = vpack.c.bf16 %v1385_v14, %v1381_v10  ;;  %vm2717_vm2 = vmpackc.low %vm1257_vm15, %vm1253_vm11 }
 0x215   : > { %v908_v27 = vadd.f32 %v907_v22, %v3991_v29  ;;  %v1101_v3 = vadd.f32 %v1100_v23, %v3993_v30  ;;  %v909_v32 = vpop.f32.mrb[46].mxu0  ;;  %v1102_v34 = vpop.f32.mrb[46].mxu1  ;;  %vm4439_vm3 = vmpackc.low %vm1256_vm13, %vm1252_vm9 }
 0x216   : > { %v911_v35 = vpop.f32.mrb[47].mxu0  ;;  %v1104_v36 = vpop.f32.mrb[47].mxu1  ;;  %vm1258_vm4 = vcmp.gt.f32.partialorder %v906_v20, %v3995_v31  ;;  %v1386_v38 = vmax.f32 %v906_v20, 0.0  ;;  %vm1260_vm5 = vcmp.gt.f32.partialorder %v1099_v21, %v3997_v33  ;;  %v1388_v40 = vmax.f32 %v1099_v21, 0.0  ;;  %2623 = vmatprep.mubr.msk.bf16.mxu0 %vm2621_vm1, %v2622_v24  ;;  %2719 = vmatprep.mubr.msk.bf16.mxu1 %vm2717_vm2, %v2718_v25 }
 0x217   : > { %v910_v42 = vadd.f32 %v909_v32, %v3986_v26  ;;  %v1103_v43 = vadd.f32 %v1102_v34, %v3989_v28  ;;  %v912_v44 = vadd.f32 %v911_v35, %v3991_v29  ;;  %v1105_v45 = vadd.f32 %v1104_v36, %v3993_v30  ;;  %2626 = vmatmul.mubr.msk.bf16.gmra.mrb[104].mxu0 %vm4421_vm0, %v2625_v18 }
 0x218   : > { %vm1259_vm6 = vcmp.gt.f32.partialorder %v908_v27, %v4002_v39  ;;  %v1387_v46 = vmax.f32 %v908_v27, 0.0  ;;  %vm1261_vm7 = vcmp.gt.f32.partialorder %v1101_v3, %v4005_v41  ;;  %v1389_v47 = vmax.f32 %v1101_v3, 0.0  ;;  %2722 = vmatmul.mubr.msk.bf16.gmra.mrb[104].mxu1 %vm4439_vm3, %v2721_v19 }
 0x219   : > { %vm1262_vm8 = vcmp.gt.f32.partialorder %v910_v42, %v3995_v31  ;;  %v1390_v48 = vmax.f32 %v910_v42, 0.0  ;;  %vm1264_vm9 = vcmp.gt.f32.partialorder %v1103_v43, %v3997_v33  ;;  %v1392_v49 = vmax.f32 %v1103_v43, 0.0 }
 0x21a   : > { %vm1263_vm10 = vcmp.gt.f32.partialorder %v912_v44, %v4002_v39  ;;  %v1391_v50 = vmax.f32 %v912_v44, 0.0  ;;  %vm1265_vm11 = vcmp.gt.f32.partialorder %v1105_v45, %v4005_v41  ;;  %v1393_v51 = vmax.f32 %v1105_v45, 0.0  ;;  %vm4461_vm12 = vmpackc.low %vm1262_vm8, %vm1258_vm4 }
 0x21b   : > { %v915_v52 = vpop.f32.mrb[48].mxu0  ;;  %v1108_v53 = vpop.f32.mrb[48].mxu1  ;;  %v2631_v55 = vpack.c.bf16 %v1390_v48, %v1386_v38  ;;  %v2727_v56 = vpack.c.bf16 %v1392_v49, %v1388_v40  ;;  %vm2627_vm13 = vmpackc.low %vm1263_vm10, %vm1259_vm6 }
 0x21c   : > { %v916_v57 = vadd.f32 %v915_v52, %v3986_v26  ;;  %v1109_v58 = vadd.f32 %v1108_v53, %v3989_v28  ;;  %v917_v59 = vpop.f32.mrb[49].mxu0  ;;  %v1110_v60 = vpop.f32.mrb[49].mxu1  ;;  %v2628_v61 = vpack.c.bf16 %v1391_v50, %v1387_v46  ;;  %v2724_v62 = vpack.c.bf16 %v1393_v51, %v1389_v47  ;;  %vm2723_vm14 = vmpackc.low %vm1265_vm11, %vm1261_vm7 }
 0x21d   : > { %v918_v63 = vadd.f32 %v917_v59, %v3991_v29  ;;  %v1111_v0 = vadd.f32 %v1110_v60, %v3993_v30  ;;  %v919_v1 = vpop.f32.mrb[50].mxu0  ;;  %v1112_v2 = vpop.f32.mrb[50].mxu1  ;;  %vm4479_vm15 = vmpackc.low %vm1264_vm9, %vm1260_vm5 }
 0x21e   : > { %v921_v4 = vpop.f32.mrb[51].mxu0  ;;  %v1114_v5 = vpop.f32.mrb[51].mxu1  ;;  %vm1266_vm0 = vcmp.gt.f32.partialorder %v916_v57, %v3995_v31  ;;  %v1394_v7 = vmax.f32 %v916_v57, 0.0  ;;  %vm1268_vm1 = vcmp.gt.f32.partialorder %v1109_v58, %v3997_v33  ;;  %v1396_v8 = vmax.f32 %v1109_v58, 0.0  ;;  %2629 = vmatprep.mubr.msk.bf16.mxu0 %vm2627_vm13, %v2628_v61  ;;  %2725 = vmatprep.mubr.msk.bf16.mxu1 %vm2723_vm14, %v2724_v62 }
 0x21f   : > { %v920_v9 = vadd.f32 %v919_v1, %v3986_v26  ;;  %v1113_v10 = vadd.f32 %v1112_v2, %v3989_v28  ;;  %v922_v11 = vadd.f32 %v921_v4, %v3991_v29  ;;  %v1115_v12 = vadd.f32 %v1114_v5, %v3993_v30  ;;  %2632 = vmatmul.mubr.msk.bf16.gmra.mrb[108].mxu0 %vm4461_vm12, %v2631_v55 }
 0x220   : > { %vm1267_vm2 = vcmp.gt.f32.partialorder %v918_v63, %v4002_v39  ;;  %v1395_v13 = vmax.f32 %v918_v63, 0.0  ;;  %vm1269_vm3 = vcmp.gt.f32.partialorder %v1111_v0, %v4005_v41  ;;  %v1397_v14 = vmax.f32 %v1111_v0, 0.0  ;;  %2728 = vmatmul.mubr.msk.bf16.gmra.mrb[108].mxu1 %vm4479_vm15, %v2727_v56 }
 0x221   : > { %vm1270_vm4 = vcmp.gt.f32.partialorder %v920_v9, %v3995_v31  ;;  %v1398_v15 = vmax.f32 %v920_v9, 0.0  ;;  %vm1272_vm5 = vcmp.gt.f32.partialorder %v1113_v10, %v3997_v33  ;;  %v1400_v16 = vmax.f32 %v1113_v10, 0.0 }
 0x222   : > { %vm1271_vm6 = vcmp.gt.f32.partialorder %v922_v11, %v4002_v39  ;;  %v1399_v17 = vmax.f32 %v922_v11, 0.0  ;;  %vm1273_vm7 = vcmp.gt.f32.partialorder %v1115_v12, %v4005_v41  ;;  %v1401_v18 = vmax.f32 %v1115_v12, 0.0  ;;  %vm4501_vm8 = vmpackc.low %vm1270_vm4, %vm1266_vm0 }
 0x223   : > { %v925_v19 = vpop.f32.mrb[52].mxu0  ;;  %v1118_v20 = vpop.f32.mrb[52].mxu1  ;;  %v2637_v22 = vpack.c.bf16 %v1398_v15, %v1394_v7  ;;  %v2733_v23 = vpack.c.bf16 %v1400_v16, %v1396_v8  ;;  %vm2633_vm9 = vmpackc.low %vm1271_vm6, %vm1267_vm2 }
 0x224   : > { %v926_v24 = vadd.f32 %v925_v19, %v3986_v26  ;;  %v1119_v25 = vadd.f32 %v1118_v20, %v3989_v28  ;;  %v927_v27 = vpop.f32.mrb[53].mxu0  ;;  %v1120_v3 = vpop.f32.mrb[53].mxu1  ;;  %v2634_v32 = vpack.c.bf16 %v1399_v17, %v1395_v13  ;;  %v2730_v34 = vpack.c.bf16 %v1401_v18, %v1397_v14  ;;  %vm2729_vm10 = vmpackc.low %vm1273_vm7, %vm1269_vm3 }
 0x225   : > { %v928_v35 = vadd.f32 %v927_v27, %v3991_v29  ;;  %v1121_v36 = vadd.f32 %v1120_v3, %v3993_v30  ;;  %v929_v37 = vpop.f32.mrb[54].mxu0  ;;  %v1122_v38 = vpop.f32.mrb[54].mxu1  ;;  %vm4519_vm11 = vmpackc.low %vm1272_vm5, %vm1268_vm1 }
 0x226   : > { %v931_v40 = vpop.f32.mrb[55].mxu0  ;;  %v1124_v42 = vpop.f32.mrb[55].mxu1  ;;  %vm1274_vm12 = vcmp.gt.f32.partialorder %v926_v24, %v3995_v31  ;;  %v1402_v44 = vmax.f32 %v926_v24, 0.0  ;;  %vm1276_vm13 = vcmp.gt.f32.partialorder %v1119_v25, %v3997_v33  ;;  %v1404_v45 = vmax.f32 %v1119_v25, 0.0  ;;  %2635 = vmatprep.mubr.msk.bf16.mxu0 %vm2633_vm9, %v2634_v32  ;;  %2731 = vmatprep.mubr.msk.bf16.mxu1 %vm2729_vm10, %v2730_v34 }
 0x227   : > { %v930_v46 = vadd.f32 %v929_v37, %v3986_v26  ;;  %v1123_v47 = vadd.f32 %v1122_v38, %v3989_v28  ;;  %v932_v48 = vadd.f32 %v931_v40, %v3991_v29  ;;  %v1125_v49 = vadd.f32 %v1124_v42, %v3993_v30  ;;  %2638 = vmatmul.mubr.msk.bf16.gmra.mrb[112].mxu0 %vm4501_vm8, %v2637_v22 }
 0x228   : > { %vm1275_vm14 = vcmp.gt.f32.partialorder %v928_v35, %v4002_v39  ;;  %v1403_v50 = vmax.f32 %v928_v35, 0.0  ;;  %vm1277_vm15 = vcmp.gt.f32.partialorder %v1121_v36, %v4005_v41  ;;  %v1405_v51 = vmax.f32 %v1121_v36, 0.0  ;;  %2734 = vmatmul.mubr.msk.bf16.gmra.mrb[112].mxu1 %vm4519_vm11, %v2733_v23 }
 0x229   : > { %vm1278_vm0 = vcmp.gt.f32.partialorder %v930_v46, %v3995_v31  ;;  %v1406_v52 = vmax.f32 %v930_v46, 0.0  ;;  %vm1280_vm1 = vcmp.gt.f32.partialorder %v1123_v47, %v3997_v33  ;;  %v1408_v53 = vmax.f32 %v1123_v47, 0.0 }
 0x22a   : > { %vm1279_vm2 = vcmp.gt.f32.partialorder %v932_v48, %v4002_v39  ;;  %v1407_v54 = vmax.f32 %v932_v48, 0.0  ;;  %vm1281_vm3 = vcmp.gt.f32.partialorder %v1125_v49, %v4005_v41  ;;  %v1409_v55 = vmax.f32 %v1125_v49, 0.0  ;;  %vm4541_vm4 = vmpackc.low %vm1278_vm0, %vm1274_vm12 }
 0x22b   : > { %v935_v56 = vpop.f32.mrb[56].mxu0  ;;  %v1128_v57 = vpop.f32.mrb[56].mxu1  ;;  %v2643_v59 = vpack.c.bf16 %v1406_v52, %v1402_v44  ;;  %v2739_v60 = vpack.c.bf16 %v1408_v53, %v1404_v45  ;;  %vm2639_vm5 = vmpackc.low %vm1279_vm2, %vm1275_vm14 }
 0x22c   : > { %v936_v61 = vadd.f32 %v935_v56, %v3986_v26  ;;  %v1129_v62 = vadd.f32 %v1128_v57, %v3989_v28  ;;  %v937_v63 = vpop.f32.mrb[57].mxu0  ;;  %v1130_v0 = vpop.f32.mrb[57].mxu1  ;;  %v2640_v1 = vpack.c.bf16 %v1407_v54, %v1403_v50  ;;  %v2736_v2 = vpack.c.bf16 %v1409_v55, %v1405_v51  ;;  %vm2735_vm6 = vmpackc.low %vm1281_vm3, %vm1277_vm15 }
 0x22d   : > { %v938_v4 = vadd.f32 %v937_v63, %v3991_v29  ;;  %v1131_v5 = vadd.f32 %v1130_v0, %v3993_v30  ;;  %v939_v6 = vpop.f32.mrb[58].mxu0  ;;  %v1132_v7 = vpop.f32.mrb[58].mxu1  ;;  %vm4559_vm7 = vmpackc.low %vm1280_vm1, %vm1276_vm13 }
 0x22e   : > { %v941_v8 = vpop.f32.mrb[59].mxu0  ;;  %v1134_v9 = vpop.f32.mrb[59].mxu1  ;;  %vm1282_vm8 = vcmp.gt.f32.partialorder %v936_v61, %v3995_v31  ;;  %v1410_v11 = vmax.f32 %v936_v61, 0.0  ;;  %vm1284_vm9 = vcmp.gt.f32.partialorder %v1129_v62, %v3997_v33  ;;  %v1412_v12 = vmax.f32 %v1129_v62, 0.0  ;;  %2641 = vmatprep.mubr.msk.bf16.mxu0 %vm2639_vm5, %v2640_v1  ;;  %2737 = vmatprep.mubr.msk.bf16.mxu1 %vm2735_vm6, %v2736_v2  ;;  %v1554_v1 = vld [vmem:[%s3835_s13] sm:$0xff] }
 0x22f   : > { %v940_v13 = vadd.f32 %v939_v6, %v3986_v26  ;;  %v1133_v14 = vadd.f32 %v1132_v7, %v3989_v28  ;;  %v942_v15 = vadd.f32 %v941_v8, %v3991_v29  ;;  %v1135_v16 = vadd.f32 %v1134_v9, %v3993_v30  ;;  %2644 = vmatmul.mubr.msk.bf16.gmra.mrb[116].mxu0 %vm4541_vm4, %v2643_v59  ;;  %v1555_v6 = vld [vmem:[%s3835_s13 + $0x8] sm:$0xff] }
 0x230   : > { %vm1283_vm10 = vcmp.gt.f32.partialorder %v938_v4, %v4002_v39  ;;  %v1411_v17 = vmax.f32 %v938_v4, 0.0  ;;  %vm1285_vm11 = vcmp.gt.f32.partialorder %v1131_v5, %v4005_v41  ;;  %v1413_v18 = vmax.f32 %v1131_v5, 0.0  ;;  %2740 = vmatmul.mubr.msk.bf16.gmra.mrb[116].mxu1 %vm4559_vm7, %v2739_v60 }
 0x231   : > { %vm1286_vm12 = vcmp.gt.f32.partialorder %v940_v13, %v3995_v31  ;;  %v1414_v19 = vmax.f32 %v940_v13, 0.0  ;;  %vm1288_vm13 = vcmp.gt.f32.partialorder %v1133_v14, %v3997_v33  ;;  %v1416_v20 = vmax.f32 %v1133_v14, 0.0 }
 0x232   : > { %vm1287_vm14 = vcmp.gt.f32.partialorder %v942_v15, %v4002_v39  ;;  %v1415_v21 = vmax.f32 %v942_v15, 0.0  ;;  %vm1289_vm15 = vcmp.gt.f32.partialorder %v1135_v16, %v4005_v41  ;;  %v1417_v22 = vmax.f32 %v1135_v16, 0.0  ;;  %vm4581_vm0 = vmpackc.low %vm1286_vm12, %vm1282_vm8 }
 0x233   : > { %v945_v23 = vpop.f32.mrb[60].mxu0  ;;  %v1138_v24 = vpop.f32.mrb[60].mxu1  ;;  %v2649_v27 = vpack.c.bf16 %v1414_v19, %v1410_v11  ;;  %v2745_v3 = vpack.c.bf16 %v1416_v20, %v1412_v12  ;;  %vm2645_vm1 = vmpackc.low %vm1287_vm14, %vm1283_vm10  ;;  %v1556_v19 = vld [vmem:[%s3835_s13 + $0x10] sm:$0xff] }
 0x234   : > { %v946_v32 = vadd.f32 %v945_v23, %v3986_v26  ;;  %v1139_v34 = vadd.f32 %v1138_v24, %v3989_v28  ;;  %v947_v35 = vpop.f32.mrb[61].mxu0  ;;  %v1140_v36 = vpop.f32.mrb[61].mxu1  ;;  %v2646_v37 = vpack.c.bf16 %v1415_v21, %v1411_v17  ;;  %v2742_v38 = vpack.c.bf16 %v1417_v22, %v1413_v18  ;;  %vm2741_vm2 = vmpackc.low %vm1289_vm15, %vm1285_vm11  ;;  %v1557_v24 = vld [vmem:[%s3835_s13 + $0x18] sm:$0xff] }
 0x235   : > { %v948_v40 = vadd.f32 %v947_v35, %v3991_v29  ;;  %v1141_v42 = vadd.f32 %v1140_v36, %v3993_v30  ;;  %v949_v43 = vpop.f32.mrb[62].mxu0  ;;  %v1142_v44 = vpop.f32.mrb[62].mxu1  ;;  %vm2744_vm3 = vmpackc.low %vm1288_vm13, %vm1284_vm9 }
 0x236   : > { %v951_v45 = vpop.f32.mrb[63].mxu0  ;;  %v1144_v46 = vpop.f32.mrb[63].mxu1  ;;  %vm1290_vm4 = vcmp.gt.f32.partialorder %v946_v32, %v3995_v31  ;;  %v1418_v47 = vmax.f32 %v946_v32, 0.0  ;;  %2647 = vmatprep.mubr.msk.bf16.mxu0 %vm2645_vm1, %v2646_v37  ;;  %2743 = vmatprep.mubr.msk.bf16.mxu1 %vm2741_vm2, %v2742_v38  ;;  %v950_v48 = vadd.f32 %v949_v43, %v3986_v26  ;;  %v1143_v49 = vadd.f32 %v1142_v44, %v3989_v28  ;;  %v1558_v44 = vld [vmem:[%s3835_s13 + $0x20] sm:$0xff] }
 0x237   : > { %v952_v50 = vadd.f32 %v951_v45, %v3991_v29  ;;  %v1145_v51 = vadd.f32 %v1144_v46, %v3993_v30  ;;  %2650 = vmatmul.mubr.msk.bf16.gmra.mrb[120].mxu0 %vm4581_vm0, %v2649_v27  ;;  %v1420_v52 = vmax.f32 %v1139_v34, 0.0  ;;  %vm1291_vm5 = vcmp.gt.f32.partialorder %v948_v40, %v4002_v39 }
 0x238   : > { %v1419_v53 = vmax.f32 %v948_v40, 0.0  ;;  %v1421_v54 = vmax.f32 %v1141_v42, 0.0  ;;  %2746 = vmatmul.mubr.msk.bf16.gmra.mrb[120].mxu1 %vm2744_vm3, %v2745_v3  ;;  %vm1294_vm6 = vcmp.gt.f32.partialorder %v950_v48, %v3995_v31  ;;  %v1422_v55 = vmax.f32 %v950_v48, 0.0 }
 0x239   : > { %vm1296_vm7 = vcmp.gt.f32.partialorder %v1143_v49, %v3997_v33  ;;  %v1424_v26 = vmax.f32 %v1143_v49, 0.0  ;;  %vm1295_vm8 = vcmp.gt.f32.partialorder %v952_v50, %v4002_v39  ;;  %v1423_v28 = vmax.f32 %v952_v50, 0.0  ;;  %vm2654_vm10 = vmpackc.low %vm1294_vm6, %vm1290_vm4  ;;  %v1559_v49 = vld [vmem:[%s3835_s13 + $0x28] sm:$0xff] }
 0x23a   : > { %vm1297_vm9 = vcmp.gt.f32.partialorder %v1145_v51, %v4005_v41  ;;  %v1425_v29 = vmax.f32 %v1145_v51, 0.0  ;;  %vm1293_vm11 = vcmp.gt.f32.partialorder %v1141_v42, %v4005_v41  ;;  %v2655_v30 = vpack.c.bf16 %v1422_v55, %v1418_v47  ;;  %vm2651_vm12 = vmpackc.low %vm1295_vm8, %vm1291_vm5 }
 0x23b   : > { %v2751_v56 = vpack.c.bf16 %v1424_v26, %v1420_v52  ;;  %vm1292_vm13 = vcmp.gt.f32.partialorder %v1139_v34, %v3997_v33  ;;  %v2652_v57 = vpack.c.bf16 %v1423_v28, %v1419_v53  ;;  %vm2747_vm14 = vmpackc.low %vm1297_vm9, %vm1293_vm11 }
 0x23c   : > { %v2748_v58 = vpack.c.bf16 %v1425_v29, %v1421_v54  ;;  %vm2750_vm15 = vmpackc.low %vm1296_vm7, %vm1292_vm13 }
 0x23d   : > { %2653 = vmatprep.mubr.msk.bf16.mxu0 %vm2651_vm12, %v2652_v57 }
 0x23e   : > { %2749 = vmatprep.mubr.msk.bf16.mxu1 %vm2747_vm14, %v2748_v58  ;;  %v1560_v58 = vld [vmem:[%s3835_s13 + $0x30] sm:$0xff] }
 0x23f   : > { %2656 = vmatmul.mubr.msk.bf16.gmra.mrb[124].mxu0 %vm2654_vm10, %v2655_v30 }
 0x240   : > { %2752 = vmatmul.mubr.msk.bf16.gmra.mrb[124].mxu1 %vm2750_vm15, %v2751_v56 }
 0x29a   : > { %v2779_v31 = vpop.f32.mrb[64].mxu0 }
 0x29b   : > { %v2891_v41 = vpop.f32.mrb[64].mxu1  ;;  %v2780_v59 = vpop.f32.mrb[65].mxu0 }
 0x29c   : > { %v2781_v39 = vadd.f32 %v2780_v59, %v2779_v31  ;;  %v2892_v60 = vpop.f32.mrb[65].mxu1  ;;  %v2782_v61 = vpop.f32.mrb[66].mxu0 }
 0x29d   : > { %v2893_v62 = vadd.f32 %v2892_v60, %v2891_v41  ;;  %v2894_v63 = vpop.f32.mrb[66].mxu1  ;;  %v2783_v0 = vpop.f32.mrb[67].mxu0  ;;  %v1561_v60 = vld [vmem:[%s3835_s13 + $0x38] sm:$0xff] }
 0x29e   : > { %v2784_v2 = vadd.f32 %v2783_v0, %v2782_v61  ;;  %v2895_v33 = vpop.f32.mrb[67].mxu1 }
 0x29f   : > { %v2102_v4 = vadd.f32 %v2893_v62, %v2781_v39  ;;  %v2896_v5 = vadd.f32 %v2895_v33, %v2894_v63 }
 0x2a1   : > { %v2228_v7 = vadd.f32 %v2102_v4, %v1554_v1  ;;  %v2105_v8 = vadd.f32 %v2896_v5, %v2784_v2 }
 0x2a2   : > { %v2785_v9 = vpop.f32.mrb[68].mxu0 }
 0x2a3   : > { %2260 = vst [vmem:[%s3835_s13] sm:$0xff] %v2228_v7  ;;  %v2229_v10 = vadd.f32 %v2105_v8, %v1555_v6  ;;  %v2897_v11 = vpop.f32.mrb[68].mxu1  ;;  %v2786_v12 = vpop.f32.mrb[69].mxu0 }
 0x2a4   : > { %v2787_v13 = vadd.f32 %v2786_v12, %v2785_v9  ;;  %v2898_v14 = vpop.f32.mrb[69].mxu1  ;;  %v2788_v15 = vpop.f32.mrb[70].mxu0  ;;  %v1562_v9 = vld [vmem:[%s3835_s13 + $0x40] sm:$0xff] }
 0x2a5   : > { %2261 = vst [vmem:[%s3835_s13 + $0x8] sm:$0xff] %v2229_v10  ;;  %v2899_v16 = vadd.f32 %v2898_v14, %v2897_v11  ;;  %v2900_v17 = vpop.f32.mrb[70].mxu1  ;;  %v2789_v18 = vpop.f32.mrb[71].mxu0  ;;  %v1563_v14 = vld [vmem:[%s3835_s13 + $0x48] sm:$0xff] }
 0x2a6   : > { %v2790_v20 = vadd.f32 %v2789_v18, %v2788_v15  ;;  %v2901_v21 = vpop.f32.mrb[71].mxu1 }
 0x2a7   : > { %v2110_v22 = vadd.f32 %v2899_v16, %v2787_v13  ;;  %v2902_v23 = vadd.f32 %v2901_v21, %v2900_v17 }
 0x2a9   : > { %v2230_v25 = vadd.f32 %v2110_v22, %v1556_v19  ;;  %v2113_v27 = vadd.f32 %v2902_v23, %v2790_v20 }
 0x2aa   : > { %v2791_v3 = vpop.f32.mrb[72].mxu0 }
 0x2ab   : > { %2262 = vst [vmem:[%s3835_s13 + $0x10] sm:$0xff] %v2230_v25  ;;  %v2231_v32 = vadd.f32 %v2113_v27, %v1557_v24  ;;  %v2903_v34 = vpop.f32.mrb[72].mxu1  ;;  %v2792_v35 = vpop.f32.mrb[73].mxu0 }
 0x2ac   : > { %v2793_v36 = vadd.f32 %v2792_v35, %v2791_v3  ;;  %v2904_v37 = vpop.f32.mrb[73].mxu1  ;;  %v2794_v38 = vpop.f32.mrb[74].mxu0  ;;  %v1564_v3 = vld [vmem:[%s3835_s13 + $0x50] sm:$0xff] }
 0x2ad   : > { %2263 = vst [vmem:[%s3835_s13 + $0x18] sm:$0xff] %v2231_v32  ;;  %v2905_v40 = vadd.f32 %v2904_v37, %v2903_v34  ;;  %v2906_v42 = vpop.f32.mrb[74].mxu1  ;;  %v2795_v43 = vpop.f32.mrb[75].mxu0  ;;  %v1565_v37 = vld [vmem:[%s3835_s13 + $0x58] sm:$0xff] }
 0x2ae   : > { %v2796_v45 = vadd.f32 %v2795_v43, %v2794_v38  ;;  %v2907_v46 = vpop.f32.mrb[75].mxu1 }
 0x2af   : > { %v2118_v47 = vadd.f32 %v2905_v40, %v2793_v36  ;;  %v2908_v48 = vadd.f32 %v2907_v46, %v2906_v42 }
 0x2b1   : > { %v2232_v50 = vadd.f32 %v2118_v47, %v1558_v44  ;;  %v2121_v51 = vadd.f32 %v2908_v48, %v2796_v45 }
 0x2b2   : > { %v2797_v52 = vpop.f32.mrb[76].mxu0 }
 0x2b3   : > { %2264 = vst [vmem:[%s3835_s13 + $0x20] sm:$0xff] %v2232_v50  ;;  %v2233_v53 = vadd.f32 %v2121_v51, %v1559_v49  ;;  %v2909_v54 = vpop.f32.mrb[76].mxu1  ;;  %v2798_v55 = vpop.f32.mrb[77].mxu0 }
 0x2b4   : > { %v2799_v26 = vadd.f32 %v2798_v55, %v2797_v52  ;;  %v2910_v28 = vpop.f32.mrb[77].mxu1  ;;  %v2800_v29 = vpop.f32.mrb[78].mxu0  ;;  %v1566_v52 = vld [vmem:[%s3835_s13 + $0x60] sm:$0xff] }
 0x2b5   : > { %2265 = vst [vmem:[%s3835_s13 + $0x28] sm:$0xff] %v2233_v53  ;;  %v2911_v30 = vadd.f32 %v2910_v28, %v2909_v54  ;;  %v2912_v56 = vpop.f32.mrb[78].mxu1  ;;  %v2801_v57 = vpop.f32.mrb[79].mxu0  ;;  %v1567_v28 = vld [vmem:[%s3835_s13 + $0x68] sm:$0xff] }
 0x2b6   : > { %v2802_v31 = vadd.f32 %v2801_v57, %v2800_v29  ;;  %v2913_v41 = vpop.f32.mrb[79].mxu1 }
 0x2b7   : > { %v2126_v59 = vadd.f32 %v2911_v30, %v2799_v26  ;;  %v2914_v39 = vadd.f32 %v2913_v41, %v2912_v56 }
 0x2b9   : > { %v2234_v61 = vadd.f32 %v2126_v59, %v1560_v58  ;;  %v2129_v62 = vadd.f32 %v2914_v39, %v2802_v31 }
 0x2ba   : > { %v2803_v63 = vpop.f32.mrb[80].mxu0 }
 0x2bb   : > { %2266 = vst [vmem:[%s3835_s13 + $0x30] sm:$0xff] %v2234_v61  ;;  %v2235_v0 = vadd.f32 %v2129_v62, %v1561_v60  ;;  %v2915_v1 = vpop.f32.mrb[80].mxu1  ;;  %v2804_v2 = vpop.f32.mrb[81].mxu0 }
 0x2bc   : > { %v2805_v33 = vadd.f32 %v2804_v2, %v2803_v63  ;;  %v2916_v4 = vpop.f32.mrb[81].mxu1  ;;  %v2806_v5 = vpop.f32.mrb[82].mxu0  ;;  %v1568_v63 = vld [vmem:[%s3835_s13 + $0x70] sm:$0xff] }
 0x2bd   : > { %2267 = vst [vmem:[%s3835_s13 + $0x38] sm:$0xff] %v2235_v0  ;;  %v2917_v6 = vadd.f32 %v2916_v4, %v2915_v1  ;;  %v2918_v7 = vpop.f32.mrb[82].mxu1  ;;  %v2807_v8 = vpop.f32.mrb[83].mxu0  ;;  %v1569_v4 = vld [vmem:[%s3835_s13 + $0x78] sm:$0xff] }
 0x2be   : > { %v2808_v10 = vadd.f32 %v2807_v8, %v2806_v5  ;;  %v2919_v11 = vpop.f32.mrb[83].mxu1 }
 0x2bf   : > { %v2134_v12 = vadd.f32 %v2917_v6, %v2805_v33  ;;  %v2920_v13 = vadd.f32 %v2919_v11, %v2918_v7 }
 0x2c1   : > { %v2236_v15 = vadd.f32 %v2134_v12, %v1562_v9  ;;  %v2137_v16 = vadd.f32 %v2920_v13, %v2808_v10 }
 0x2c2   : > { %v2809_v17 = vpop.f32.mrb[84].mxu0 }
 0x2c3   : > { %2268 = vst [vmem:[%s3835_s13 + $0x40] sm:$0xff] %v2236_v15  ;;  %v2237_v18 = vadd.f32 %v2137_v16, %v1563_v14  ;;  %v2921_v19 = vpop.f32.mrb[84].mxu1  ;;  %v2810_v20 = vpop.f32.mrb[85].mxu0 }
 0x2c4   : > { %v2811_v21 = vadd.f32 %v2810_v20, %v2809_v17  ;;  %v2922_v22 = vpop.f32.mrb[85].mxu1  ;;  %v2812_v23 = vpop.f32.mrb[86].mxu0  ;;  %v1570_v17 = vld [vmem:[%s3835_s13 + $0x80] sm:$0xff] }
 0x2c5   : > { %2269 = vst [vmem:[%s3835_s13 + $0x48] sm:$0xff] %v2237_v18  ;;  %v2923_v24 = vadd.f32 %v2922_v22, %v2921_v19  ;;  %v2924_v25 = vpop.f32.mrb[86].mxu1  ;;  %v2813_v27 = vpop.f32.mrb[87].mxu0  ;;  %v1571_v22 = vld [vmem:[%s3835_s13 + $0x88] sm:$0xff] }
 0x2c6   : > { %v2814_v32 = vadd.f32 %v2813_v27, %v2812_v23  ;;  %v2925_v34 = vpop.f32.mrb[87].mxu1 }
 0x2c7   : > { %v2142_v35 = vadd.f32 %v2923_v24, %v2811_v21  ;;  %v2926_v36 = vadd.f32 %v2925_v34, %v2924_v25 }
 0x2c9   : > { %v2238_v38 = vadd.f32 %v2142_v35, %v1564_v3  ;;  %v2145_v40 = vadd.f32 %v2926_v36, %v2814_v32 }
 0x2ca   : > { %v2815_v42 = vpop.f32.mrb[88].mxu0 }
 0x2cb   : > { %2270 = vst [vmem:[%s3835_s13 + $0x50] sm:$0xff] %v2238_v38  ;;  %v2239_v43 = vadd.f32 %v2145_v40, %v1565_v37  ;;  %v2927_v44 = vpop.f32.mrb[88].mxu1  ;;  %v2816_v45 = vpop.f32.mrb[89].mxu0 }
 0x2cc   : > { %v2817_v46 = vadd.f32 %v2816_v45, %v2815_v42  ;;  %v2928_v47 = vpop.f32.mrb[89].mxu1  ;;  %v2818_v48 = vpop.f32.mrb[90].mxu0  ;;  %v1572_v42 = vld [vmem:[%s3835_s13 + $0x90] sm:$0xff] }
 0x2cd   : > { %2271 = vst [vmem:[%s3835_s13 + $0x58] sm:$0xff] %v2239_v43  ;;  %v2929_v49 = vadd.f32 %v2928_v47, %v2927_v44  ;;  %v2930_v50 = vpop.f32.mrb[90].mxu1  ;;  %v2819_v51 = vpop.f32.mrb[91].mxu0  ;;  %v1573_v47 = vld [vmem:[%s3835_s13 + $0x98] sm:$0xff] }
 0x2ce   : > { %v2820_v53 = vadd.f32 %v2819_v51, %v2818_v48  ;;  %v2931_v54 = vpop.f32.mrb[91].mxu1 }
 0x2cf   : > { %v2150_v55 = vadd.f32 %v2929_v49, %v2817_v46  ;;  %v2932_v26 = vadd.f32 %v2931_v54, %v2930_v50 }
 0x2d1   : > { %v2240_v29 = vadd.f32 %v2150_v55, %v1566_v52  ;;  %v2153_v30 = vadd.f32 %v2932_v26, %v2820_v53 }
 0x2d2   : > { %v2821_v56 = vpop.f32.mrb[92].mxu0 }
 0x2d3   : > { %2272 = vst [vmem:[%s3835_s13 + $0x60] sm:$0xff] %v2240_v29  ;;  %v2241_v57 = vadd.f32 %v2153_v30, %v1567_v28  ;;  %v2933_v58 = vpop.f32.mrb[92].mxu1  ;;  %v2822_v31 = vpop.f32.mrb[93].mxu0 }
 0x2d4   : > { %v2823_v41 = vadd.f32 %v2822_v31, %v2821_v56  ;;  %v2934_v59 = vpop.f32.mrb[93].mxu1  ;;  %v2824_v39 = vpop.f32.mrb[94].mxu0  ;;  %v1574_v56 = vld [vmem:[%s3835_s13 + $0xa0] sm:$0xff] }
 0x2d5   : > { %2273 = vst [vmem:[%s3835_s13 + $0x68] sm:$0xff] %v2241_v57  ;;  %v2935_v60 = vadd.f32 %v2934_v59, %v2933_v58  ;;  %v2936_v61 = vpop.f32.mrb[94].mxu1  ;;  %v2825_v62 = vpop.f32.mrb[95].mxu0  ;;  %v1575_v59 = vld [vmem:[%s3835_s13 + $0xa8] sm:$0xff] }
 0x2d6   : > { %v2826_v0 = vadd.f32 %v2825_v62, %v2824_v39  ;;  %v2937_v1 = vpop.f32.mrb[95].mxu1 }
 0x2d7   : > { %v2158_v2 = vadd.f32 %v2935_v60, %v2823_v41  ;;  %v2938_v33 = vadd.f32 %v2937_v1, %v2936_v61 }
 0x2d9   : > { %v2242_v5 = vadd.f32 %v2158_v2, %v1568_v63  ;;  %v2161_v6 = vadd.f32 %v2938_v33, %v2826_v0 }
 0x2da   : > { %v2827_v7 = vpop.f32.mrb[96].mxu0 }
 0x2db   : > { %2274 = vst [vmem:[%s3835_s13 + $0x70] sm:$0xff] %v2242_v5  ;;  %v2243_v8 = vadd.f32 %v2161_v6, %v1569_v4  ;;  %v2939_v9 = vpop.f32.mrb[96].mxu1  ;;  %v2828_v10 = vpop.f32.mrb[97].mxu0 }
 0x2dc   : > { %v2829_v11 = vadd.f32 %v2828_v10, %v2827_v7  ;;  %v2940_v12 = vpop.f32.mrb[97].mxu1  ;;  %v2830_v13 = vpop.f32.mrb[98].mxu0  ;;  %v1576_v7 = vld [vmem:[%s3835_s13 + $0xb0] sm:$0xff] }
 0x2dd   : > { %2275 = vst [vmem:[%s3835_s13 + $0x78] sm:$0xff] %v2243_v8  ;;  %v2941_v14 = vadd.f32 %v2940_v12, %v2939_v9  ;;  %v2942_v15 = vpop.f32.mrb[98].mxu1  ;;  %v2831_v16 = vpop.f32.mrb[99].mxu0  ;;  %v1577_v12 = vld [vmem:[%s3835_s13 + $0xb8] sm:$0xff] }
 0x2de   : > { %v2832_v18 = vadd.f32 %v2831_v16, %v2830_v13  ;;  %v2943_v19 = vpop.f32.mrb[99].mxu1 }
 0x2df   : > { %v2166_v20 = vadd.f32 %v2941_v14, %v2829_v11  ;;  %v2944_v21 = vadd.f32 %v2943_v19, %v2942_v15 }
 0x2e1   : > { %v2244_v23 = vadd.f32 %v2166_v20, %v1570_v17  ;;  %v2169_v24 = vadd.f32 %v2944_v21, %v2832_v18 }
 0x2e2   : > { %v2833_v25 = vpop.f32.mrb[100].mxu0 }
 0x2e3   : > { %2276 = vst [vmem:[%s3835_s13 + $0x80] sm:$0xff] %v2244_v23  ;;  %v2245_v27 = vadd.f32 %v2169_v24, %v1571_v22  ;;  %v2945_v3 = vpop.f32.mrb[100].mxu1  ;;  %v2834_v32 = vpop.f32.mrb[101].mxu0 }
 0x2e4   : > { %v2835_v34 = vadd.f32 %v2834_v32, %v2833_v25  ;;  %v2946_v35 = vpop.f32.mrb[101].mxu1  ;;  %v2836_v36 = vpop.f32.mrb[102].mxu0  ;;  %v1578_v25 = vld [vmem:[%s3835_s13 + $0xc0] sm:$0xff] }
 0x2e5   : > { %2277 = vst [vmem:[%s3835_s13 + $0x88] sm:$0xff] %v2245_v27  ;;  %v2947_v37 = vadd.f32 %v2946_v35, %v2945_v3  ;;  %v2948_v38 = vpop.f32.mrb[102].mxu1  ;;  %v2837_v40 = vpop.f32.mrb[103].mxu0  ;;  %v1579_v35 = vld [vmem:[%s3835_s13 + $0xc8] sm:$0xff] }
 0x2e6   : > { %v2838_v43 = vadd.f32 %v2837_v40, %v2836_v36  ;;  %v2949_v44 = vpop.f32.mrb[103].mxu1 }
 0x2e7   : > { %v2174_v45 = vadd.f32 %v2947_v37, %v2835_v34  ;;  %v2950_v46 = vadd.f32 %v2949_v44, %v2948_v38 }
 0x2e9   : > { %v2246_v48 = vadd.f32 %v2174_v45, %v1572_v42  ;;  %v2177_v49 = vadd.f32 %v2950_v46, %v2838_v43 }
 0x2ea   : > { %v2839_v50 = vpop.f32.mrb[104].mxu0 }
 0x2eb   : > { %2278 = vst [vmem:[%s3835_s13 + $0x90] sm:$0xff] %v2246_v48  ;;  %v2247_v51 = vadd.f32 %v2177_v49, %v1573_v47  ;;  %v2951_v52 = vpop.f32.mrb[104].mxu1  ;;  %v2840_v53 = vpop.f32.mrb[105].mxu0 }
 0x2ec   : > { %v2841_v54 = vadd.f32 %v2840_v53, %v2839_v50  ;;  %v2952_v55 = vpop.f32.mrb[105].mxu1  ;;  %v2842_v26 = vpop.f32.mrb[106].mxu0  ;;  %v1580_v50 = vld [vmem:[%s3835_s13 + $0xd0] sm:$0xff] }
 0x2ed   : > { %2279 = vst [vmem:[%s3835_s13 + $0x98] sm:$0xff] %v2247_v51  ;;  %v2953_v28 = vadd.f32 %v2952_v55, %v2951_v52  ;;  %v2954_v29 = vpop.f32.mrb[106].mxu1  ;;  %v2843_v30 = vpop.f32.mrb[107].mxu0  ;;  %v1581_v55 = vld [vmem:[%s3835_s13 + $0xd8] sm:$0xff] }
 0x2ee   : > { %v2844_v57 = vadd.f32 %v2843_v30, %v2842_v26  ;;  %v2955_v58 = vpop.f32.mrb[107].mxu1 }
 0x2ef   : > { %v2182_v31 = vadd.f32 %v2953_v28, %v2841_v54  ;;  %v2956_v41 = vadd.f32 %v2955_v58, %v2954_v29 }
 0x2f1   : > { %v2248_v39 = vadd.f32 %v2182_v31, %v1574_v56  ;;  %v2185_v60 = vadd.f32 %v2956_v41, %v2844_v57 }
 0x2f2   : > { %v2845_v61 = vpop.f32.mrb[108].mxu0 }
 0x2f3   : > { %2280 = vst [vmem:[%s3835_s13 + $0xa0] sm:$0xff] %v2248_v39  ;;  %v2249_v62 = vadd.f32 %v2185_v60, %v1575_v59  ;;  %v2957_v63 = vpop.f32.mrb[108].mxu1  ;;  %v2846_v0 = vpop.f32.mrb[109].mxu0 }
 0x2f4   : > { %v2847_v1 = vadd.f32 %v2846_v0, %v2845_v61  ;;  %v2958_v2 = vpop.f32.mrb[109].mxu1  ;;  %v2848_v33 = vpop.f32.mrb[110].mxu0  ;;  %v1582_v61 = vld [vmem:[%s3835_s13 + $0xe0] sm:$0xff] }
 0x2f5   : > { %2281 = vst [vmem:[%s3835_s13 + $0xa8] sm:$0xff] %v2249_v62  ;;  %v2959_v4 = vadd.f32 %v2958_v2, %v2957_v63  ;;  %v2960_v5 = vpop.f32.mrb[110].mxu1  ;;  %v2849_v6 = vpop.f32.mrb[111].mxu0  ;;  %v1583_v2 = vld [vmem:[%s3835_s13 + $0xe8] sm:$0xff] }
 0x2f6   : > { %v2850_v8 = vadd.f32 %v2849_v6, %v2848_v33  ;;  %v2961_v9 = vpop.f32.mrb[111].mxu1 }
 0x2f7   : > { %v2190_v10 = vadd.f32 %v2959_v4, %v2847_v1  ;;  %v2962_v11 = vadd.f32 %v2961_v9, %v2960_v5 }
 0x2f9   : > { %v2250_v13 = vadd.f32 %v2190_v10, %v1576_v7  ;;  %v2193_v14 = vadd.f32 %v2962_v11, %v2850_v8 }
 0x2fa   : > { %v2851_v15 = vpop.f32.mrb[112].mxu0 }
 0x2fb   : > { %2282 = vst [vmem:[%s3835_s13 + $0xb0] sm:$0xff] %v2250_v13  ;;  %v2251_v16 = vadd.f32 %v2193_v14, %v1577_v12  ;;  %v2963_v17 = vpop.f32.mrb[112].mxu1  ;;  %v2852_v18 = vpop.f32.mrb[113].mxu0 }
 0x2fc   : > { %v2853_v19 = vadd.f32 %v2852_v18, %v2851_v15  ;;  %v2964_v20 = vpop.f32.mrb[113].mxu1  ;;  %v2854_v21 = vpop.f32.mrb[114].mxu0  ;;  %v1584_v15 = vld [vmem:[%s3835_s13 + $0xf0] sm:$0xff] }
 0x2fd   : > { %2283 = vst [vmem:[%s3835_s13 + $0xb8] sm:$0xff] %v2251_v16  ;;  %v2965_v22 = vadd.f32 %v2964_v20, %v2963_v17  ;;  %v2966_v23 = vpop.f32.mrb[114].mxu1  ;;  %v2855_v24 = vpop.f32.mrb[115].mxu0  ;;  %v1585_v20 = vld [vmem:[%s3835_s13 + $0xf8] sm:$0xff] }
 0x2fe   : > { %v2856_v27 = vadd.f32 %v2855_v24, %v2854_v21  ;;  %v2967_v3 = vpop.f32.mrb[115].mxu1 }
 0x2ff   : > { %v2198_v32 = vadd.f32 %v2965_v22, %v2853_v19  ;;  %v2968_v34 = vadd.f32 %v2967_v3, %v2966_v23 }
 0x301   : > { %v2252_v36 = vadd.f32 %v2198_v32, %v1578_v25  ;;  %v2201_v37 = vadd.f32 %v2968_v34, %v2856_v27 }
 0x302   : > { %v2857_v38 = vpop.f32.mrb[116].mxu0 }
 0x303   : > { %2284 = vst [vmem:[%s3835_s13 + $0xc0] sm:$0xff] %v2252_v36  ;;  %v2253_v40 = vadd.f32 %v2201_v37, %v1579_v35  ;;  %v2969_v42 = vpop.f32.mrb[116].mxu1  ;;  %v2858_v43 = vpop.f32.mrb[117].mxu0 }
 0x304   : > { %v2859_v44 = vadd.f32 %v2858_v43, %v2857_v38  ;;  %v2970_v45 = vpop.f32.mrb[117].mxu1  ;;  %v2860_v46 = vpop.f32.mrb[118].mxu0 }
 0x305   : > { %2285 = vst [vmem:[%s3835_s13 + $0xc8] sm:$0xff] %v2253_v40  ;;  %v2971_v47 = vadd.f32 %v2970_v45, %v2969_v42  ;;  %v2972_v48 = vpop.f32.mrb[118].mxu1  ;;  %v2861_v49 = vpop.f32.mrb[119].mxu0 }
 0x306   : > { %v2862_v51 = vadd.f32 %v2861_v49, %v2860_v46  ;;  %v2973_v52 = vpop.f32.mrb[119].mxu1 }
 0x307   : > { %v2206_v53 = vadd.f32 %v2971_v47, %v2859_v44  ;;  %v2974_v54 = vadd.f32 %v2973_v52, %v2972_v48 }
 0x309   : > { %v2254_v26 = vadd.f32 %v2206_v53, %v1580_v50  ;;  %v2209_v28 = vadd.f32 %v2974_v54, %v2862_v51 }
 0x30a   : > { %v2863_v29 = vpop.f32.mrb[120].mxu0 }
 0x30b   : > { %2286 = vst [vmem:[%s3835_s13 + $0xd0] sm:$0xff] %v2254_v26  ;;  %v2255_v30 = vadd.f32 %v2209_v28, %v1581_v55  ;;  %v2975_v56 = vpop.f32.mrb[120].mxu1  ;;  %v2864_v57 = vpop.f32.mrb[121].mxu0 }
 0x30c   : > { %v2865_v58 = vadd.f32 %v2864_v57, %v2863_v29  ;;  %v2976_v31 = vpop.f32.mrb[121].mxu1  ;;  %v2866_v41 = vpop.f32.mrb[122].mxu0 }
 0x30d   : > { %2287 = vst [vmem:[%s3835_s13 + $0xd8] sm:$0xff] %v2255_v30  ;;  %v2977_v59 = vadd.f32 %v2976_v31, %v2975_v56  ;;  %v2978_v39 = vpop.f32.mrb[122].mxu1  ;;  %v2867_v60 = vpop.f32.mrb[123].mxu0 }
 0x30e   : > { %v2868_v62 = vadd.f32 %v2867_v60, %v2866_v41  ;;  %v2979_v63 = vpop.f32.mrb[123].mxu1 }
 0x30f   : > { %v2214_v0 = vadd.f32 %v2977_v59, %v2865_v58  ;;  %v2980_v1 = vadd.f32 %v2979_v63, %v2978_v39 }
 0x311   : > { %v2256_v33 = vadd.f32 %v2214_v0, %v1582_v61  ;;  %v2217_v4 = vadd.f32 %v2980_v1, %v2868_v62 }
 0x312   : > { %v2869_v5 = vpop.f32.mrb[124].mxu0 }
 0x313   : > { %2288 = vst [vmem:[%s3835_s13 + $0xe0] sm:$0xff] %v2256_v33  ;;  %v2257_v6 = vadd.f32 %v2217_v4, %v1583_v2  ;;  %v2981_v7 = vpop.f32.mrb[124].mxu1  ;;  %v2870_v8 = vpop.f32.mrb[125].mxu0 }
 0x314   : > { %v2871_v9 = vadd.f32 %v2870_v8, %v2869_v5  ;;  %v2982_v10 = vpop.f32.mrb[125].mxu1  ;;  %v2872_v11 = vpop.f32.mrb[126].mxu0 }
 0x315   : > { %2289 = vst [vmem:[%s3835_s13 + $0xe8] sm:$0xff] %v2257_v6  ;;  %v2983_v12 = vadd.f32 %v2982_v10, %v2981_v7  ;;  %v2984_v13 = vpop.f32.mrb[126].mxu1  ;;  %v2873_v14 = vpop.f32.mrb[127].mxu0 }
 0x316   : > { %v2874_v16 = vadd.f32 %v2873_v14, %v2872_v11  ;;  %v2985_v17 = vpop.f32.mrb[127].mxu1 }
 0x317   : > { %v2222_v18 = vadd.f32 %v2983_v12, %v2871_v9  ;;  %v2986_v19 = vadd.f32 %v2985_v17, %v2984_v13 }
 0x319   : > { %v2258_v21 = vadd.f32 %v2222_v18, %v1584_v15  ;;  %v2225_v22 = vadd.f32 %v2986_v19, %v2874_v16 }
 0x31b   : > { %2290 = vst [vmem:[%s3835_s13 + $0xf0] sm:$0xff] %v2258_v21  ;;  %v2259_v23 = vadd.f32 %v2225_v22, %v1585_v20 }
 0x31d   : > { %2291 = vst [vmem:[%s3835_s13 + $0xf8] sm:$0xff] %v2259_v23 }
 0x31e   : > { %3341 = shalt.err (!%p3338_p0)
}
 0x31f   : > { %s3342_s11 = scalar_lea.hbm %s4686_s0, 4096  ;;  %s3346_s10 = scalar_lea.hbm %s4870_s7, 8192 }
 0x320   : > { %p3343_p10 = scmp.ne.s32.totalorder %s4686_s0, %s3342_s11  ;;  %p3347_p1 = scmp.lt.u32.totalorder %s4686_s0, %s4870_s7 }
 0x321   : > { %p3348_p13 = scmp.lt.u32.totalorder %s3346_s10, %s3342_s11  ;;  %p3350_p4 = scmp.lt.u32.totalorder %s3342_s11, %s4686_s0 }
 0x322   : > { %p3344_p7 = pnand %p3343_p10, %p4871_p12 }
 0x323   : > { %p3349_p6 = por %p3348_p13, %p3347_p1 }
 0x324   : > { %p3345_p8 = pneg %p3344_p7 }
 0x325   : > { %p3351_p11 = por %p3350_p4, %p3349_p6 }
 0x327   : > { %p3352_p5 = pnand %p3351_p11, %p3345_p8 }
 0x329   : > { %3355 = shalt.err (!%p3352_p5)
}
 0x32a   : > { %s3471_s13 = smov 128   ;;  %s3472_s23 = smov 8  }
 0x32b   : > { %2995 = dma.vmem_to_hbm [thread:$0]  (%p4871_p12), %s4688_s5, 4096, %s4686_s0, %s2293_s14, %s3471_s13, %s3471_s13, %s3472_s23  }
 0x32c PF: > { %s4872_s12 = sld [smem:[#allocation23_spill]]  ;;  %p3015_p3 = scmp.ge.s32.totalorder %s3458_s28, 2 }
 0x32d   : > { %s2321_s16 = sand.u32 1, %s3430_s21  }
 0x32e   : > { %s2322_s24 = scalar_lea.sflag [#allocation4], %s2321_s16 }
 0x332   : > { %p4873_p9 = scmp.ne.s32.totalorder %s4872_s12, 0 }
 0x334   : > { %p3011_p2 = pnand %p3015_p3, %p4873_p9 }
 0x336   : > { %3413 = dma.done.wait (!%p3011_p2), %s2322_s24, 4096  }
 0x337   : > { %3415 = vsyncadd (!%p3011_p2), %s2322_s24, 4294963200  ;;  %s27_s28 = sadd.s32 1, %s3458_s28   ;;  %s4874_s25 = sld [smem:[#allocation15_spill]] }
 0x338   : > { %p24_p0 = scmp.ge.s32.totalorder %s27_s28, 6   ;;  %s4875_s20 = sld [smem:[#allocation21_spill]] }
 0x339   : > { %s4876_s4 = sld [smem:[#allocation16_spill]]  ;;  %s4877_s23 = sld [smem:[#allocation22_spill]] }
 0x33a   : > { %s4878_s17 = sld [smem:[#allocation18_spill]]  ;;  %s4879_s5 = sld [smem:[#allocation19_spill]] }
 0x33b   : > { %s4880_s27 = sld [smem:[#allocation20_spill]]  ;;  %s4881_s18 = smov %s3422_s19 }
 0x33c   : > { %s4883_s21 = smov %s3434_s22  ;;  %s4885_s24 = smov %s3450_s26 }
 0x33d   : > { %s4882_s19 = smov %s4874_s25  ;;  %26 = sbr.rel (!%p24_p0) target bundleno = 18 (0x12), region = 127 }
 0x33f   : > { %s4884_s22 = smov %s4876_s4 }
 0x340   : > { %s4886_s25 = smov %s4878_s17  ;;  %s4887_s26 = smov %s4879_s5 }
 0x344   :  { %2327 = vsyncpa [#allocation3], 1 }
 0x345   :  { %2329 = vsyncpa [#allocation3 + $0x1], 1 }
 0x346   :  { %2330 = vsyncpa [#allocation6], 1 }
 0x347   :  { %2332 = vsyncpa [#allocation6 + $0x1], 1 }
 0x348   :  { %2333 = vsyncpa [#allocation9], 1 }
 0x349   :  { %2335 = vsyncpa [#allocation9 + $0x1], 1 }
 0x34a   :  { %2336 = vsyncpa [#allocation4], 1 }
 0x34b   :  { %2338 = vsyncpa [#allocation4 + $0x1], 1 }

</bundles_post_ra>
